<compile_context>
chip_gen: v7x
topology: tpu7x:2x2x1
jax: 0.10.0
libtpu: 0.0.40
codegen_flags: <defaults>
</compile_context>

<pallas_src>
import jax
import jax.numpy as jnp
from jax.experimental import pallas as pl
from jax.experimental.pallas import tpu as pltpu


# ---------------------------------------------------------------------------
# Pallas kernel: one full attention-decoder step.
# ---------------------------------------------------------------------------
def _attn_decoder_step_kernel(xh_ref, c0_ref, enc_ref,
                              w_lstm_ref, b_lstm_ref,
                              w_score_ref, b_score_ref,
                              w_cat_h_ref, w_cat_c_ref, b_cat_ref,
                              w_out_ref, b_out_ref,
                              logits_ref, h1_ref, c1_ref):
    H = h1_ref.shape[-1]

    # ---- single LSTM step; all four gates in ONE fused MXU matmul ----------
    # xh = [emb | h0] (B, E+H),  w_lstm = [W_ih^T ; W_hh^T] (E+H, 4H)
    gates = (jnp.dot(xh_ref[...], w_lstm_ref[...],
                     preferred_element_type=jnp.float32)
             + b_lstm_ref[...])                                   # (B, 4H)
    i = jax.nn.sigmoid(gates[:, 0 * H:1 * H])                     # lane-aligned
    f = jax.nn.sigmoid(gates[:, 1 * H:2 * H])
    g = jnp.tanh(gates[:, 2 * H:3 * H])
    o = jax.nn.sigmoid(gates[:, 3 * H:4 * H])
    c1 = f * c0_ref[...] + i * g
    h1 = o * jnp.tanh(c1)                                         # rnn_output (B, H)
    h1_ref[...] = h1
    c1_ref[...] = c1

    # ---- attention --------------------------------------------------------
    # PyTorch:  energy = Linear(enc);  attn_logits = sum_h h1 * energy
    # Dual form (same math, far less work): apply the score weights to the
    # single query h1 instead of all T encoder timesteps.
    #   attn_logits[b,t] = enc[b,t,:] . (h1 @ W_score)[b,:] + h1[b,:] . b_score
    enc = enc_ref[...]                                            # (B, T, H)
    v = jnp.dot(h1, w_score_ref[...],
                preferred_element_type=jnp.float32)               # (B, H)
    hb = jnp.sum(h1 * b_score_ref[...], axis=-1, keepdims=True)   # (B, 1)
    attn_logits = jnp.sum(enc * v[:, None, :], axis=-1) + hb      # (B, T)

    # stable softmax over the encoder-time axis
    m = jnp.max(attn_logits, axis=-1, keepdims=True)
    p = jnp.exp(attn_logits - m)
    attn = p / jnp.sum(p, axis=-1, keepdims=True)                 # (B, T)

    # context = attn.bmm(encoder_outputs)
    context = jnp.sum(attn[:, :, None] * enc, axis=1)             # (B, H)

    # ---- concat Linear + tanh (split matmul == [h1|context] @ W_concat^T) --
    concat_out = jnp.tanh(
        jnp.dot(h1, w_cat_h_ref[...], preferred_element_type=jnp.float32)
        + jnp.dot(context, w_cat_c_ref[...], preferred_element_type=jnp.float32)
        + b_cat_ref[...])                                         # (B, H)

    # ---- output Linear -----------------------------------------------------
    logits_ref[...] = (jnp.dot(concat_out, w_out_ref[...],
                               preferred_element_type=jnp.float32)
                       + b_out_ref[...])                          # (B, V)


def attn_decoder_pallas(xh, c0, enc, w_lstm, b_lstm, w_score, b_score,
                        w_cat_h, w_cat_c, b_cat, w_out, b_out):
    B, H = c0.shape
    V = w_out.shape[1]
    vmem = pl.BlockSpec(memory_space=pltpu.MemorySpace.VMEM)
    return pl.pallas_call(
        _attn_decoder_step_kernel,
        out_shape=(jax.ShapeDtypeStruct((B, V), jnp.float32),   # logits
                   jax.ShapeDtypeStruct((B, H), jnp.float32),   # h_n
                   jax.ShapeDtypeStruct((B, H), jnp.float32)),  # c_n
        in_specs=[vmem] * 12,
        out_specs=(vmem, vmem, vmem),
    )(xh, c0, enc, w_lstm, b_lstm, w_score, b_score,
      w_cat_h, w_cat_c, b_cat, w_out, b_out)


# ---------------------------------------------------------------------------
# Parameters + forward (glue in plain JAX, fused step in Pallas).
# ---------------------------------------------------------------------------
def init_attn_decoder_params(key, emb_size, hidden_size, output_size):
    ks = jax.random.split(key, 12)

    def u(k, shape, fan_in):
        bound = float(fan_in) ** -0.5
        return jax.random.uniform(k, shape, jnp.float32, -bound, bound)

    H, E, V = hidden_size, emb_size, output_size
    return dict(
        embedding=jax.random.normal(ks[0], (V, E), jnp.float32),
        # nn.LSTM(emb_size, hidden_size), 1 layer, unidirectional
        w_ih=u(ks[1], (4 * H, E), H),
        w_hh=u(ks[2], (4 * H, H), H),
        b_ih=u(ks[3], (4 * H,), H),
        b_hh=u(ks[4], (4 * H,), H),
        # score: Linear(H, H)
        w_score=u(ks[5], (H, H), H),
        b_score=u(ks[6], (H,), H),
        # concat: Linear(2H, H)
        w_concat=u(ks[7], (H, 2 * H), 2 * H),
        b_concat=u(ks[8], (H,), 2 * H),
        # out: Linear(H, V)
        w_out=u(ks[9], (V, H), H),
        b_out=u(ks[10], (V,), H),
    )


def attn_decoder_forward(params, input_step, decoder_hidden, encoder_outputs,
                         hidden_size):
    H = hidden_size
    h0 = decoder_hidden[0][0].astype(jnp.float32)                  # (B, H)
    c0 = decoder_hidden[1][0].astype(jnp.float32)                  # (B, H)

    # embedding lookup; embedding_dropout is identity in eval mode
    emb = jnp.take(params["embedding"], input_step, axis=0).astype(jnp.float32)

    # fuse the LSTM input/hidden projections into one matmul operand pair
    xh = jnp.concatenate([emb, h0], axis=1)                        # (B, E+H)
    w_lstm = jnp.concatenate([params["w_ih"].T, params["w_hh"].T], axis=0)
    b_lstm = (params["b_ih"] + params["b_hh"])[None, :]            # (1, 4H)

    w_score = params["w_score"]                                    # (H, H), used as h1 @ W
    b_score = params["b_score"][None, :]                           # (1, H)
    w_cat_h = params["w_concat"][:, :H].T                          # (H, H)
    w_cat_c = params["w_concat"][:, H:].T                          # (H, H)
    b_cat = params["b_concat"][None, :]                            # (1, H)
    w_out = params["w_out"].T                                      # (H, V)
    b_out = params["b_out"][None, :]                               # (1, V)

    logits, h1, c1 = attn_decoder_pallas(
        xh, c0, encoder_outputs.astype(jnp.float32),
        w_lstm, b_lstm, w_score, b_score,
        w_cat_h, w_cat_c, b_cat, w_out, b_out)

    # hidden returned in PyTorch layout: (h_n, c_n), each (1, B, H)
    return logits, (h1[None], c1[None])


# ---------------------------------------------------------------------------
# Pure-JAX reference (exact PyTorch op order) for the correctness check.
# ---------------------------------------------------------------------------
def attn_decoder_reference(params, input_step, decoder_hidden, encoder_outputs,
                           hidden_size):
    H = hidden_size
    h0 = decoder_hidden[0][0]
    c0 = decoder_hidden[1][0]
    emb = jnp.take(params["embedding"], input_step, axis=0)        # (B, E)

    gates = (emb @ params["w_ih"].T + h0 @ params["w_hh"].T
             + params["b_ih"] + params["b_hh"])
    i = jax.nn.sigmoid(gates[:, 0 * H:1 * H])
    f = jax.nn.sigmoid(gates[:, 1 * H:2 * H])
    g = jnp.tanh(gates[:, 2 * H:3 * H])
    o = jax.nn.sigmoid(gates[:, 3 * H:4 * H])
    c1 = f * c0 + i * g
    h1 = o * jnp.tanh(c1)                                          # (B, H)

    rnn_output = h1[:, None, :]                                    # (B, 1, H)
    energy = encoder_outputs @ params["w_score"].T + params["b_score"]
    attn = jnp.sum(rnn_output * energy, axis=2)                    # (B, T)
    attn = jax.nn.softmax(attn, axis=1)                            # (B, T)
    context = jnp.einsum("bt,bth->bh", attn, encoder_outputs)      # (B, H)

    concat_input = jnp.concatenate([h1, context], axis=1)          # (B, 2H)
    concat_output = jnp.tanh(concat_input @ params["w_concat"].T
                             + params["b_concat"])
    output = concat_output @ params["w_out"].T + params["b_out"]   # (B, V)
    return output, (h1[None], c1[None])


if __name__ == "__main__":
    # Small but lane/sublane-dense shapes: B fills the 8 f32 sublanes,
    # H is one full 128-lane vreg row, V = 2 lanes of 128.
    emb_size, hidden_size, output_size = 128, 128, 256
    batch, enc_len = 8, 16

    key = jax.random.PRNGKey(0)
    kp, kt, kh, ke = jax.random.split(key, 4)
    params = init_attn_decoder_params(kp, emb_size, hidden_size, output_size)

    input_step = jax.random.randint(kt, (batch,), 0, output_size, dtype=jnp.int32)
    hn = 0.1 * jax.random.normal(kh, (1, batch, hidden_size), jnp.float32)
    cn = jnp.zeros((1, batch, hidden_size), jnp.float32)           # matches spec
    decoder_hidden = (hn, cn)
    encoder_outputs = 0.1 * jax.random.normal(
        ke, (batch, enc_len, hidden_size), jnp.float32)

    logits, hidden = attn_decoder_forward(params, input_step, decoder_hidden,
                                          encoder_outputs, hidden_size)
    jax.block_until_ready((logits, hidden))

    ref_logits, ref_hidden = attn_decoder_reference(
        params, input_step, decoder_hidden, encoder_outputs, hidden_size)

    assert logits.shape == (batch, output_size)
    assert hidden[0].shape == (1, batch, hidden_size)
    assert hidden[1].shape == (1, batch, hidden_size)
    assert jnp.allclose(logits, ref_logits, rtol=2e-4, atol=2e-4)
    assert jnp.allclose(hidden[0], ref_hidden[0], rtol=2e-4, atol=2e-4)
    assert jnp.allclose(hidden[1], ref_hidden[1], rtol=2e-4, atol=2e-4)

    print("KERNEL_OK")
</pallas_src>

<mosaic_0001>
module attributes {stable_mosaic.version = 11 : i64} {
  func.func @_attn_decoder_step_kernel(%arg0: memref<8x256xf32, #tpu.memory_space<vmem>>, %arg1: memref<8x128xf32, #tpu.memory_space<vmem>>, %arg2: memref<8x16x128xf32, #tpu.memory_space<vmem>>, %arg3: memref<256x512xf32, #tpu.memory_space<vmem>>, %arg4: memref<1x512xf32, #tpu.memory_space<vmem>>, %arg5: memref<128x128xf32, #tpu.memory_space<vmem>>, %arg6: memref<1x128xf32, #tpu.memory_space<vmem>>, %arg7: memref<128x128xf32, #tpu.memory_space<vmem>>, %arg8: memref<128x128xf32, #tpu.memory_space<vmem>>, %arg9: memref<1x128xf32, #tpu.memory_space<vmem>>, %arg10: memref<128x256xf32, #tpu.memory_space<vmem>>, %arg11: memref<1x256xf32, #tpu.memory_space<vmem>>, %arg12: memref<8x256xf32, #tpu.memory_space<vmem>>, %arg13: memref<8x128xf32, #tpu.memory_space<vmem>>, %arg14: memref<8x128xf32, #tpu.memory_space<vmem>>) attributes {dimension_semantics = [], scalar_prefetch = 0 : i64, scratch_operands = 0 : i64, tpu.core_type = #tpu.core_type<tc>} {
    %c0 = arith.constant 0 : index
    %c0_0 = arith.constant 0 : index
    %0 = vector.load %arg0[%c0, %c0_0] : memref<8x256xf32, #tpu.memory_space<vmem>>, vector<8x256xf32>
    %c0_1 = arith.constant 0 : index
    %c0_2 = arith.constant 0 : index
    %1 = vector.load %arg3[%c0_1, %c0_2] : memref<256x512xf32, #tpu.memory_space<vmem>>, vector<256x512xf32>
    %cst = arith.constant dense<0.000000e+00> : vector<8x512xf32>
    %2 = tpu.matmul %0, %1, %cst {dimension_numbers = #tpu.dot_dimension_numbers<[1], [0], [0], [1], [0, 0, 1, 1], [], []>} : vector<8x256xf32>, vector<256x512xf32>, vector<8x512xf32> -> vector<8x512xf32>
    %c0_3 = arith.constant 0 : index
    %c0_4 = arith.constant 0 : index
    %3 = vector.load %arg4[%c0_3, %c0_4] : memref<1x512xf32, #tpu.memory_space<vmem>>, vector<1x512xf32>
    %4 = vector.broadcast %3 : vector<1x512xf32> to vector<8x512xf32>
    %5 = arith.addf %2, %4 : vector<8x512xf32>
    %6 = vector.extract_strided_slice %5 {offsets = [0, 0], sizes = [8, 128], strides = [1, 1]} : vector<8x512xf32> to vector<8x128xf32>
    %7 = arith.negf %6 : vector<8x128xf32>
    %8 = math.exp %7 : vector<8x128xf32>
    %cst_5 = arith.constant 1.000000e+00 : f32
    %9 = vector.broadcast %cst_5 : f32 to vector<8x128xf32>
    %10 = arith.addf %9, %8 : vector<8x128xf32>
    %11 = arith.divf %9, %10 : vector<8x128xf32>
    %12 = vector.extract_strided_slice %5 {offsets = [0, 128], sizes = [8, 128], strides = [1, 1]} : vector<8x512xf32> to vector<8x128xf32>
    %13 = arith.negf %12 : vector<8x128xf32>
    %14 = math.exp %13 : vector<8x128xf32>
    %cst_6 = arith.constant 1.000000e+00 : f32
    %15 = vector.broadcast %cst_6 : f32 to vector<8x128xf32>
    %16 = arith.addf %15, %14 : vector<8x128xf32>
    %17 = arith.divf %15, %16 : vector<8x128xf32>
    %18 = vector.extract_strided_slice %5 {offsets = [0, 256], sizes = [8, 128], strides = [1, 1]} : vector<8x512xf32> to vector<8x128xf32>
    %19 = math.tanh %18 : vector<8x128xf32>
    %20 = vector.extract_strided_slice %5 {offsets = [0, 384], sizes = [8, 128], strides = [1, 1]} : vector<8x512xf32> to vector<8x128xf32>
    %21 = arith.negf %20 : vector<8x128xf32>
    %22 = math.exp %21 : vector<8x128xf32>
    %cst_7 = arith.constant 1.000000e+00 : f32
    %23 = vector.broadcast %cst_7 : f32 to vector<8x128xf32>
    %24 = arith.addf %23, %22 : vector<8x128xf32>
    %25 = arith.divf %23, %24 : vector<8x128xf32>
    %c0_8 = arith.constant 0 : index
    %c0_9 = arith.constant 0 : index
    %26 = vector.load %arg1[%c0_8, %c0_9] : memref<8x128xf32, #tpu.memory_space<vmem>>, vector<8x128xf32>
    %27 = arith.mulf %17, %26 : vector<8x128xf32>
    %28 = arith.mulf %11, %19 : vector<8x128xf32>
    %29 = arith.addf %27, %28 : vector<8x128xf32>
    %30 = math.tanh %29 : vector<8x128xf32>
    %31 = arith.mulf %25, %30 : vector<8x128xf32>
    %c0_10 = arith.constant 0 : index
    %c0_11 = arith.constant 0 : index
    %32 = vector.load %arg13[%c0_10, %c0_11] : memref<8x128xf32, #tpu.memory_space<vmem>>, vector<8x128xf32>
    tpu.vector_store %arg13[%c0_10, %c0_11], %31 {strides = array<i32>} : memref<8x128xf32, #tpu.memory_space<vmem>>, vector<8x128xf32>,
    %c0_12 = arith.constant 0 : index
    %c0_13 = arith.constant 0 : index
    %33 = vector.load %arg14[%c0_12, %c0_13] : memref<8x128xf32, #tpu.memory_space<vmem>>, vector<8x128xf32>
    tpu.vector_store %arg14[%c0_12, %c0_13], %29 {strides = array<i32>} : memref<8x128xf32, #tpu.memory_space<vmem>>, vector<8x128xf32>,
    %c0_14 = arith.constant 0 : index
    %c0_15 = arith.constant 0 : index
    %c0_16 = arith.constant 0 : index
    %34 = vector.load %arg2[%c0_14, %c0_15, %c0_16] : memref<8x16x128xf32, #tpu.memory_space<vmem>>, vector<8x16x128xf32>
    %c0_17 = arith.constant 0 : index
    %c0_18 = arith.constant 0 : index
    %35 = vector.load %arg5[%c0_17, %c0_18] : memref<128x128xf32, #tpu.memory_space<vmem>>, vector<128x128xf32>
    %cst_19 = arith.constant dense<0.000000e+00> : vector<8x128xf32>
    %36 = tpu.matmul %31, %35, %cst_19 {dimension_numbers = #tpu.dot_dimension_numbers<[1], [0], [0], [1], [0, 0, 1, 1], [], []>} : vector<8x128xf32>, vector<128x128xf32>, vector<8x128xf32> -> vector<8x128xf32>
    %c0_20 = arith.constant 0 : index
    %c0_21 = arith.constant 0 : index
    %37 = vector.load %arg6[%c0_20, %c0_21] : memref<1x128xf32, #tpu.memory_space<vmem>>, vector<1x128xf32>
    %38 = vector.broadcast %37 : vector<1x128xf32> to vector<8x128xf32>
    %39 = arith.mulf %31, %38 : vector<8x128xf32>
    %cst_22 = arith.constant dense<0.000000e+00> : vector<8xf32>
    %40 = vector.multi_reduction <add>, %39, %cst_22 [1] : vector<8x128xf32> to vector<8xf32>
    %41 = vector.shape_cast %40 : vector<8xf32> to vector<8x1xf32>
    %42 = vector.shape_cast %36 : vector<8x128xf32> to vector<8x1x128xf32>
    %43 = vector.broadcast %42 : vector<8x1x128xf32> to vector<8x16x128xf32>
    %44 = arith.mulf %34, %43 : vector<8x16x128xf32>
    %cst_23 = arith.constant dense<0.000000e+00> : vector<8x16xf32>
    %45 = vector.multi_reduction <add>, %44, %cst_23 [2] : vector<8x16x128xf32> to vector<8x16xf32>
    %46 = vector.broadcast %41 : vector<8x1xf32> to vector<8x16xf32>
    %47 = arith.addf %45, %46 : vector<8x16xf32>
    %cst_24 = arith.constant dense<0xFF800000> : vector<8xf32>
    %48 = vector.multi_reduction <maximumf>, %47, %cst_24 [1] : vector<8x16xf32> to vector<8xf32>
    %49 = vector.shape_cast %48 : vector<8xf32> to vector<8x1xf32>
    %50 = vector.broadcast %49 : vector<8x1xf32> to vector<8x16xf32>
    %51 = arith.subf %47, %50 : vector<8x16xf32>
    %52 = math.exp %51 : vector<8x16xf32>
    %cst_25 = arith.constant dense<0.000000e+00> : vector<8xf32>
    %53 = vector.multi_reduction <add>, %52, %cst_25 [1] : vector<8x16xf32> to vector<8xf32>
    %54 = vector.shape_cast %53 : vector<8xf32> to vector<8x1xf32>
    %55 = vector.broadcast %54 : vector<8x1xf32> to vector<8x16xf32>
    %56 = arith.divf %52, %55 : vector<8x16xf32>
    %57 = vector.shape_cast %56 : vector<8x16xf32> to vector<8x16x1xf32>
    %58 = vector.broadcast %57 : vector<8x16x1xf32> to vector<8x16x128xf32>
    %59 = arith.mulf %58, %34 : vector<8x16x128xf32>
    %cst_26 = arith.constant dense<0.000000e+00> : vector<8x128xf32>
    %60 = vector.multi_reduction <add>, %59, %cst_26 [1] : vector<8x16x128xf32> to vector<8x128xf32>
    %c0_27 = arith.constant 0 : index
    %c0_28 = arith.constant 0 : index
    %61 = vector.load %arg7[%c0_27, %c0_28] : memref<128x128xf32, #tpu.memory_space<vmem>>, vector<128x128xf32>
    %cst_29 = arith.constant dense<0.000000e+00> : vector<8x128xf32>
    %62 = tpu.matmul %31, %61, %cst_29 {dimension_numbers = #tpu.dot_dimension_numbers<[1], [0], [0], [1], [0, 0, 1, 1], [], []>} : vector<8x128xf32>, vector<128x128xf32>, vector<8x128xf32> -> vector<8x128xf32>
    %c0_30 = arith.constant 0 : index
    %c0_31 = arith.constant 0 : index
    %63 = vector.load %arg8[%c0_30, %c0_31] : memref<128x128xf32, #tpu.memory_space<vmem>>, vector<128x128xf32>
    %cst_32 = arith.constant dense<0.000000e+00> : vector<8x128xf32>
    %64 = tpu.matmul %60, %63, %cst_32 {dimension_numbers = #tpu.dot_dimension_numbers<[1], [0], [0], [1], [0, 0, 1, 1], [], []>} : vector<8x128xf32>, vector<128x128xf32>, vector<8x128xf32> -> vector<8x128xf32>
    %65 = arith.addf %62, %64 : vector<8x128xf32>
    %c0_33 = arith.constant 0 : index
    %c0_34 = arith.constant 0 : index
    %66 = vector.load %arg9[%c0_33, %c0_34] : memref<1x128xf32, #tpu.memory_space<vmem>>, vector<1x128xf32>
    %67 = vector.broadcast %66 : vector<1x128xf32> to vector<8x128xf32>
    %68 = arith.addf %65, %67 : vector<8x128xf32>
    %69 = math.tanh %68 : vector<8x128xf32>
    %c0_35 = arith.constant 0 : index
    %c0_36 = arith.constant 0 : index
    %70 = vector.load %arg10[%c0_35, %c0_36] : memref<128x256xf32, #tpu.memory_space<vmem>>, vector<128x256xf32>
    %cst_37 = arith.constant dense<0.000000e+00> : vector<8x256xf32>
    %71 = tpu.matmul %69, %70, %cst_37 {dimension_numbers = #tpu.dot_dimension_numbers<[1], [0], [0], [1], [0, 0, 1, 1], [], []>} : vector<8x128xf32>, vector<128x256xf32>, vector<8x256xf32> -> vector<8x256xf32>
    %c0_38 = arith.constant 0 : index
    %c0_39 = arith.constant 0 : index
    %72 = vector.load %arg11[%c0_38, %c0_39] : memref<1x256xf32, #tpu.memory_space<vmem>>, vector<1x256xf32>
    %73 = vector.broadcast %72 : vector<1x256xf32> to vector<8x256xf32>
    %74 = arith.addf %71, %73 : vector<8x256xf32>
    %c0_40 = arith.constant 0 : index
    %c0_41 = arith.constant 0 : index
    %75 = vector.load %arg12[%c0_40, %c0_41] : memref<8x256xf32, #tpu.memory_space<vmem>>, vector<8x256xf32>
    tpu.vector_store %arg12[%c0_40, %c0_41], %74 {strides = array<i32>} : memref<8x256xf32, #tpu.memory_space<vmem>>, vector<8x256xf32>,
    return
  }
}

</mosaic_0001>

<bundles_post_ra>
// kernel: tpu_custom_call.1
= control target key start
LH: loop header
LB: loop body
LE: loop exit
PB: predicated region body
PF: predicated region fallthrough
CT: control target
= control target key end

     0   :  { %20 = vsyncpa [#allocation3], 0  ;;  %s3138_s0 = inlined_call_operand.hbm [shape: f32[8,256], index: 0, kind: input, shape index: {}]   ;;  %s3139_s1 = inlined_call_operand.hbm [shape: f32[8,128], index: 1, kind: input, shape index: {}]   ;;  %s3140_s2 = inlined_call_operand.hbm [shape: f32[8,16,128], index: 2, kind: input, shape index: {}]   ;;  %s3141_s3 = inlined_call_operand.hbm [shape: f32[256,512], index: 3, kind: input, shape index: {}]   ;;  %s3142_s4 = inlined_call_operand.vmem [shape: f32[1,512], index: 4, kind: input, shape index: {}]   ;;  %s3143_s5 = inlined_call_operand.hbm [shape: f32[128,128], index: 5, kind: input, shape index: {}]   ;;  %s3144_s6 = inlined_call_operand.vmem [shape: f32[1,128], index: 6, kind: input, shape index: {}]   ;;  %s3145_s7 = inlined_call_operand.hbm [shape: f32[128,128], index: 7, kind: input, shape index: {}]   ;;  %s3146_s8 = inlined_call_operand.hbm [shape: f32[128,128], index: 8, kind: input, shape index: {}]   ;;  %s3147_s9 = inlined_call_operand.vmem [shape: f32[1,128], index: 9, kind: input, shape index: {}]   ;;  %s3148_s10 = inlined_call_operand.hbm [shape: f32[128,256], index: 10, kind: input, shape index: {}]   ;;  %s3149_s11 = inlined_call_operand.vmem [shape: f32[1,256], index: 11, kind: input, shape index: {}]   ;;  %s3150_s12 = inlined_call_operand.hbm [shape: f32[8,256], index: 12, kind: output, shape index: {0}]   ;;  %s3151_s13 = inlined_call_operand.hbm [shape: f32[8,128], index: 13, kind: output, shape index: {1}]   ;;  %s3152_s14 = inlined_call_operand.hbm [shape: f32[8,128], index: 14, kind: output, shape index: {2}]  }
   0x1   :  { %21 = vsyncpa [#allocation6], 0 }
   0x2   :  { %22 = vsyncpa [#allocation9], 0 }
   0x3   :  { %23 = vsyncpa [#allocation12], 0 }
   0x4   :  { %24 = vsyncpa [#allocation15], 0 }
   0x5   :  { %25 = vsyncpa [#allocation4], 0 }
   0x6   :  { %26 = vsyncpa [#allocation18], 0  ;;  %s2490_s29 = smov [#allocation5]   ;;  %s2491_s15 = smov [#allocation8]  }
   0x7   :  { %s43_s30 = sshll.u32 %s2490_s29, 4  ;;  %s64_s16 = sshll.u32 %s2491_s15, 4  ;;  %s44_s30 = int_to_ptr.vmem [resolvable:$true] %s43_s30  ;;  %s2587_s16 = int_to_ptr.vmem [resolvable:$true] %s64_s16 }
   0x8   :  { %s2234_s19 = scalar_lea.hbm %s3139_s1, 128 }
   0x9   :  { %p2235_p0 = scmp.ne.s32.totalorder %s3139_s1, %s2234_s19  ;;  %p2238_p1 = scmp.lt.u32.totalorder %s2234_s19, %s3139_s1 }
   0xb   :  { %p2240_p2 = pnand %p2238_p1, %p2235_p0 }
   0xd   :  { %2243 = shalt.err (!%p2240_p2)
}
   0xe   :  { %s2244_s24 = scalar_lea.vmem %s44_s30, 128  ;;  %p2249_p4 = scmp.lt.s32.totalorder %s44_s30, %s44_s30 }
   0xf   :  { %p2245_p3 = scmp.ne.s32.totalorder %s44_s30, %s2244_s24  ;;  %p2250_p5 = scmp.lt.s32.totalorder %s2244_s24, %s2244_s24 }
  0x11   :  { %p2251_p6 = por %p2250_p5, %p2249_p4 }
  0x13   :  { %p2252_p7 = pnand %p2251_p6, %p2245_p3 }
  0x15   :  { %2255 = shalt.err (!%p2252_p7)
}
  0x16   :  { %46 = dma.hbm_to_vmem [thread:$0]  %s3139_s1, 128, %s44_s30, [#allocation6]  }
  0x17   :  { %s2256_s29 = scalar_lea.hbm %s3141_s3, 16384 }
  0x18   :  { %p2257_p8 = scmp.ne.s32.totalorder %s3141_s3, %s2256_s29  ;;  %p2260_p9 = scmp.lt.u32.totalorder %s2256_s29, %s3141_s3 }
  0x1a   :  { %p2262_p10 = pnand %p2260_p9, %p2257_p8 }
  0x1c   :  { %2265 = shalt.err (!%p2262_p10)
}
  0x1d   :  { %s2266_s20 = scalar_lea.vmem %s2587_s16, 16384  ;;  %p2271_p12 = scmp.lt.s32.totalorder %s2587_s16, %s2587_s16 }
  0x1e   :  { %p2267_p11 = scmp.ne.s32.totalorder %s2587_s16, %s2266_s20  ;;  %p2272_p13 = scmp.lt.s32.totalorder %s2266_s20, %s2266_s20 }
  0x20   :  { %p2273_p0 = por %p2272_p13, %p2271_p12 }
  0x22   :  { %p2274_p1 = pnand %p2273_p0, %p2267_p11 }
  0x24   :  { %2277 = shalt.err (!%p2274_p1)
}
  0x25   :  { %s2492_s1 = smov 512   ;;  %s2493_s30 = smov 32  }
  0x26   :  { %70 = dma.hbm_to_vmem [thread:$0]  %s3141_s3, 16384, %s2587_s16, [#allocation9], %s2492_s1, %s2492_s1, %s2493_s30  }
  0x27   :  { %s2494_s23 = smov [#allocation11]   ;;  %s2495_s25 = smov [#allocation2]  }
  0x28   :  { %s92_s24 = sshll.u32 %s2494_s23, 4  ;;  %s33_s26 = sshll.u32 %s2495_s25, 4  ;;  %s93_s24 = int_to_ptr.vmem [resolvable:$true] %s92_s24  ;;  %s34_s26 = int_to_ptr.vmem [resolvable:$true] %s33_s26 }
  0x29   :  { %s2278_s29 = scalar_lea.hbm %s3145_s7, 2048 }
  0x2a   :  { %p2279_p2 = scmp.ne.s32.totalorder %s3145_s7, %s2278_s29  ;;  %p2282_p3 = scmp.lt.u32.totalorder %s2278_s29, %s3145_s7 }
  0x2c   :  { %p2284_p4 = pnand %p2282_p3, %p2279_p2 }
  0x2e   :  { %2287 = shalt.err (!%p2284_p4)
}
  0x2f   :  { %s2288_s3 = scalar_lea.vmem %s93_s24, 2048  ;;  %p2293_p6 = scmp.lt.s32.totalorder %s93_s24, %s93_s24 }
  0x30   :  { %p2289_p5 = scmp.ne.s32.totalorder %s93_s24, %s2288_s3  ;;  %p2294_p7 = scmp.lt.s32.totalorder %s2288_s3, %s2288_s3 }
  0x32   :  { %p2295_p8 = por %p2294_p7, %p2293_p6 }
  0x34   :  { %p2296_p9 = pnand %p2295_p8, %p2289_p5 }
  0x36   :  { %2299 = shalt.err (!%p2296_p9)
}
  0x37   :  { %s2496_s16 = smov 128   ;;  %s2497_s20 = smov 8  }
  0x38   :  { %98 = dma.hbm_to_vmem [thread:$0]  %s3145_s7, 2048, %s93_s24, [#allocation12], %s2496_s16, %s2496_s16, %s2497_s20  }
  0x39   :  { %s2300_s23 = scalar_lea.hbm %s3138_s0, 256 }
  0x3a   :  { %p2301_p10 = scmp.ne.s32.totalorder %s3138_s0, %s2300_s23  ;;  %p2304_p11 = scmp.lt.u32.totalorder %s2300_s23, %s3138_s0 }
  0x3c   :  { %p2306_p12 = pnand %p2304_p11, %p2301_p10 }
  0x3e   :  { %2309 = shalt.err (!%p2306_p12)
}
  0x3f   :  { %s2310_s15 = scalar_lea.vmem %s34_s26, 256  ;;  %p2315_p0 = scmp.lt.s32.totalorder %s34_s26, %s34_s26 }
  0x40   :  { %p2311_p13 = scmp.ne.s32.totalorder %s34_s26, %s2310_s15  ;;  %p2316_p1 = scmp.lt.s32.totalorder %s2310_s15, %s2310_s15 }
  0x42   :  { %p2317_p2 = por %p2316_p1, %p2315_p0 }
  0x44   :  { %p2318_p3 = pnand %p2317_p2, %p2311_p13 }
  0x46   :  { %2321 = shalt.err (!%p2318_p3)
}
  0x47   :  { %36 = dma.hbm_to_vmem [thread:$0]  %s3138_s0, 256, %s34_s26, [#allocation3]  }
  0x48   :  { %s2498_s17 = smov [#allocation7]   ;;  %s2499_s19 = smov [#allocation10]  }
  0x49   :  { %s52_s18 = sshll.u32 %s2498_s17, 4  ;;  %s78_s3 = sshll.u32 %s2499_s19, 4  ;;  %s53_s18 = int_to_ptr.vmem [resolvable:$true] %s52_s18  ;;  %s2645_s3 = int_to_ptr.vmem [resolvable:$true] %s78_s3 }
  0x4a   :  { %s2322_s21 = scalar_lea.hbm %s3140_s2, 2048 }
  0x4b   :  { %p2323_p4 = scmp.ne.s32.totalorder %s3140_s2, %s2322_s21  ;;  %p2326_p5 = scmp.lt.u32.totalorder %s2322_s21, %s3140_s2 }
  0x4d   :  { %p2328_p6 = pnand %p2326_p5, %p2323_p4 }
  0x4f   :  { %2331 = shalt.err (!%p2328_p6)
}
  0x50   :  { %s2332_s0 = scalar_lea.vmem %s53_s18, 2048  ;;  %p2337_p8 = scmp.lt.s32.totalorder %s53_s18, %s53_s18 }
  0x51   :  { %p2333_p7 = scmp.ne.s32.totalorder %s53_s18, %s2332_s0  ;;  %p2338_p9 = scmp.lt.s32.totalorder %s2332_s0, %s2332_s0 }
  0x53   :  { %p2339_p10 = por %p2338_p9, %p2337_p8 }
  0x55   :  { %p2340_p11 = pnand %p2339_p10, %p2333_p7 }
  0x57   :  { %2343 = shalt.err (!%p2340_p11)
}
  0x58   :  { %58 = dma.hbm_to_vmem [thread:$0]  %s3140_s2, 2048, %s53_s18, [#allocation6], %s2496_s16, %s2496_s16, %s2497_s20  }
  0x59   :  { %s2344_s7 = scalar_lea.hbm %s3143_s5, 2048 }
  0x5a   :  { %p2345_p12 = scmp.ne.s32.totalorder %s3143_s5, %s2344_s7  ;;  %p2348_p13 = scmp.lt.u32.totalorder %s2344_s7, %s3143_s5 }
  0x5c   :  { %p2350_p0 = pnand %p2348_p13, %p2345_p12 }
  0x5e   :  { %2353 = shalt.err (!%p2350_p0)
}
  0x5f   :  { %s2354_s30 = scalar_lea.vmem %s2645_s3, 2048  ;;  %p2359_p2 = scmp.lt.s32.totalorder %s2645_s3, %s2645_s3 }
  0x60   :  { %p2355_p1 = scmp.ne.s32.totalorder %s2645_s3, %s2354_s30  ;;  %p2360_p3 = scmp.lt.s32.totalorder %s2354_s30, %s2354_s30 }
  0x62   :  { %p2361_p4 = por %p2360_p3, %p2359_p2 }
  0x64   :  { %p2362_p5 = pnand %p2361_p4, %p2355_p1 }
  0x66   :  { %2365 = shalt.err (!%p2362_p5)
}
  0x67   :  { %84 = dma.hbm_to_vmem [thread:$0]  %s3143_s5, 2048, %s2645_s3, [#allocation9], %s2496_s16, %s2496_s16, %s2497_s20  }
  0x68   :  { %s2500_s21 = smov [#allocation13]   ;;  %s2501_s23 = smov [#allocation14]  }
  0x69   :  { %s104_s22 = sshll.u32 %s2500_s21, 4  ;;  %s118_s25 = sshll.u32 %s2501_s23, 4  ;;  %s105_s22 = int_to_ptr.vmem [resolvable:$true] %s104_s22  ;;  %s2682_s25 = int_to_ptr.vmem [resolvable:$true] %s118_s25 }
  0x6a   :  { %s2366_s26 = scalar_lea.hbm %s3146_s8, 2048 }
  0x6b   :  { %p2367_p6 = scmp.ne.s32.totalorder %s3146_s8, %s2366_s26  ;;  %p2370_p7 = scmp.lt.u32.totalorder %s2366_s26, %s3146_s8 }
  0x6d   :  { %p2372_p8 = pnand %p2370_p7, %p2367_p6 }
  0x6f   :  { %2375 = shalt.err (!%p2372_p8)
}
  0x70   :  { %s2376_s5 = scalar_lea.vmem %s105_s22, 2048  ;;  %p2381_p10 = scmp.lt.s32.totalorder %s105_s22, %s105_s22 }
  0x71   :  { %p2377_p9 = scmp.ne.s32.totalorder %s105_s22, %s2376_s5  ;;  %p2382_p11 = scmp.lt.s32.totalorder %s2376_s5, %s2376_s5 }
  0x73   :  { %p2383_p12 = por %p2382_p11, %p2381_p10 }
  0x75   :  { %p2384_p13 = pnand %p2383_p12, %p2377_p9 }
  0x77   :  { %2387 = shalt.err (!%p2384_p13)
}
  0x78   :  { %110 = dma.hbm_to_vmem [thread:$0]  %s3146_s8, 2048, %s105_s22, [#allocation12], %s2496_s16, %s2496_s16, %s2497_s20  }
  0x79   :  { %s2388_s1 = scalar_lea.hbm %s3148_s10, 4096 }
  0x7a   :  { %p2389_p0 = scmp.ne.s32.totalorder %s3148_s10, %s2388_s1  ;;  %p2392_p1 = scmp.lt.u32.totalorder %s2388_s1, %s3148_s10 }
  0x7c   :  { %p2394_p2 = pnand %p2392_p1, %p2389_p0 }
  0x7e   :  { %2397 = shalt.err (!%p2394_p2)
}
  0x7f   :  { %s2398_s23 = scalar_lea.vmem %s2682_s25, 4096  ;;  %p2403_p4 = scmp.lt.s32.totalorder %s2682_s25, %s2682_s25 }
  0x80   :  { %p2399_p3 = scmp.ne.s32.totalorder %s2682_s25, %s2398_s23  ;;  %p2404_p5 = scmp.lt.s32.totalorder %s2398_s23, %s2398_s23 }
  0x82   :  { %p2405_p6 = por %p2404_p5, %p2403_p4 }
  0x84   :  { %p2406_p7 = pnand %p2405_p6, %p2399_p3 }
  0x86   :  { %2409 = shalt.err (!%p2406_p7)
}
  0x87   :  { %s2502_s8 = smov 256   ;;  %s2503_s16 = smov 16  }
  0x88   :  { %124 = dma.hbm_to_vmem [thread:$0]  %s3148_s10, 4096, %s2682_s25, [#allocation15], %s2502_s8, %s2502_s8, %s2503_s16  }
  0x89   :  { %2476 = dma.done.wait [#allocation3], 256  }
  0x8a   :  { %2477 = vsyncadd [#allocation3], 4294967040 }
  0x8b   :  { %2478 = dma.done.wait [#allocation6], 2176  }
  0x8c   :  { %2479 = vsyncadd [#allocation6], 4294965120 }
  0x8d   :  { %2480 = dma.done.wait [#allocation9], 18432  }
  0x8e   :  { %2481 = vsyncadd [#allocation9], 4294948864 }
  0x8f   :  { %2482 = dma.done.wait [#allocation12], 4096  }
  0x90   :  { %2483 = vsyncadd [#allocation12], 4294963200 }
  0x91   :  { %2484 = dma.done.wait [#allocation15], 4096  }
  0x92   :  { %2485 = vsyncadd [#allocation15], 4294963200  ;;  %v154_v0 = vld [vmem:[#allocation8 + $0x8] sm:$0xff]  ;;  %v153_v2 = vld [vmem:[#allocation8] sm:$0xff]  ;;  %vm2505_vm0 = vmmov 0   ;;  %vm854_vm1 = vcmask 130112  }
  0x93   :  { %v158_v1 = vld [vmem:[#allocation8 + $0x28] sm:$0xff]  ;;  %v157_v4 = vld [vmem:[#allocation8 + $0x20] sm:$0xff]  ;;  %v156_v18 = vld [vmem:[#allocation8 + $0x18] sm:$0xff]  ;;  %vm919_vm2 = vcmask 1041409   ;;  %vm921_vm3 = vcmask 1042434   ;;  %vm923_vm4 = vcmask 1043459  }
  0x94   :  { %v1912_v3 = vpack.c.bf16 %v158_v1, %v154_v0  ;;  %v162_v5 = vld [vmem:[#allocation8 + $0x48] sm:$0xff]  ;;  %v1914_v7 = vpack.c.bf16 %v157_v4, %v153_v2  ;;  %v161_v9 = vld [vmem:[#allocation8 + $0x40] sm:$0xff]  ;;  %v160_v19 = vld [vmem:[#allocation8 + $0x38] sm:$0xff]  ;;  %vm925_vm5 = vcmask 1044484   ;;  %vm927_vm6 = vcmask 1045509   ;;  %s2509_s26 = smov [#allocation17]  }
  0x95   :  { %v166_v6 = vld [vmem:[#allocation8 + $0x68] sm:$0xff]  ;;  %v165_v10 = vld [vmem:[#allocation8 + $0x60] sm:$0xff]  ;;  %v1976_v21 = vpack.c.bf16 %v160_v19, %v156_v18  ;;  %v155_v22 = vld [vmem:[#allocation8 + $0x10] sm:$0xff]  ;;  %vm929_vm7 = vcmask 1046534   ;;  %vm931_vm8 = vcmask 1047559   ;;  %vm934_vm9 = vcmask 130048  }
  0x96   :  { %v1916_v8 = vpack.c.bf16 %v166_v6, %v162_v5  ;;  %v170_v11 = vld [vmem:[#allocation8 + $0x88] sm:$0xff]  ;;  %1913 = vmatprep.subr.bf16.mxu0 %v1912_v3  ;;  %v1918_v13 = vpack.c.bf16 %v165_v10, %v161_v9  ;;  %v169_v14 = vld [vmem:[#allocation8 + $0x80] sm:$0xff]  ;;  %v159_v23 = vld [vmem:[#allocation8 + $0x30] sm:$0xff]  ;;  %s1721_s28 = sshll.u32 %s2509_s26, 4  ;;  %s1722_s28 = int_to_ptr.vmem [resolvable:$true] %s1721_s28 }
  0x97   :  { %v174_v12 = vld [vmem:[#allocation8 + $0xa8] sm:$0xff]  ;;  %1915 = vmatpush1.bf16.msra.mxu0 %v1914_v7  ;;  %v173_v15 = vld [vmem:[#allocation8 + $0xa0] sm:$0xff]  ;;  %v1978_v24 = vpack.c.bf16 %v159_v23, %v155_v22  ;;  %1977 = vmatprep.subr.bf16.mxu1 %v1976_v21  ;;  %v164_v26 = vld [vmem:[#allocation8 + $0x58] sm:$0xff]  ;;  %s2410_s29 = scalar_lea.vmem %s1722_s28, 128  ;;  %p2415_p9 = scmp.lt.s32.totalorder %s1722_s28, %s1722_s28 }
  0x98   :  { %1917 = vmatprep.subr.bf16.mxu0 %v1916_v8  ;;  %v1920_v16 = vpack.c.bf16 %v174_v12, %v170_v11  ;;  %v178_v17 = vld [vmem:[#allocation8 + $0xc8] sm:$0xff]  ;;  %v1922_v25 = vpack.c.bf16 %v173_v15, %v169_v14  ;;  %v168_v27 = vld [vmem:[#allocation8 + $0x78] sm:$0xff]  ;;  %v163_v28 = vld [vmem:[#allocation8 + $0x50] sm:$0xff]  ;;  %p2411_p8 = scmp.ne.s32.totalorder %s1722_s28, %s2410_s29  ;;  %p2416_p10 = scmp.lt.s32.totalorder %s2410_s29, %s2410_s29 }
  0x99   :  { %v182_v20 = vld [vmem:[#allocation8 + $0xe8] sm:$0xff]  ;;  %v177_v30 = vld [vmem:[#allocation8 + $0xc0] sm:$0xff]  ;;  %1979 = vmatpush1.bf16.msra.mxu1 %v1978_v24  ;;  %v1980_v32 = vpack.c.bf16 %v168_v27, %v164_v26  ;;  %v167_v33 = vld [vmem:[#allocation8 + $0x70] sm:$0xff] }
  0x9a   :  { %v1924_v29 = vpack.c.bf16 %v182_v20, %v178_v17  ;;  %v181_v31 = vld [vmem:[#allocation8 + $0xe0] sm:$0xff]  ;;  %v186_v34 = vld [vmem:[#allocation8 + $0x108] sm:$0xff]  ;;  %v1982_v36 = vpack.c.bf16 %v167_v33, %v163_v28  ;;  %v172_v37 = vld [vmem:[#allocation8 + $0x98] sm:$0xff]  ;;  %p2417_p11 = por %p2416_p10, %p2415_p9 }
  0x9b   :  { %1919 = vmatpush1.bf16.msra.mxu0 %v1918_v13  ;;  %v190_v35 = vld [vmem:[#allocation8 + $0x128] sm:$0xff]  ;;  %1981 = vmatprep.subr.bf16.mxu1 %v1980_v32  ;;  %v176_v38 = vld [vmem:[#allocation8 + $0xb8] sm:$0xff]  ;;  %v171_v39 = vld [vmem:[#allocation8 + $0x90] sm:$0xff]  ;;  %v1926_v41 = vpack.c.bf16 %v181_v31, %v177_v30 }
  0x9c   :  { %1921 = vmatprep.subr.bf16.mxu0 %v1920_v16  ;;  %v175_v40 = vld [vmem:[#allocation8 + $0xb0] sm:$0xff]  ;;  %v185_v42 = vld [vmem:[#allocation8 + $0x100] sm:$0xff]  ;;  %v1984_v44 = vpack.c.bf16 %v176_v38, %v172_v37  ;;  %v1928_v45 = vpack.c.bf16 %v190_v35, %v186_v34  ;;  %v194_v46 = vld [vmem:[#allocation8 + $0x148] sm:$0xff]  ;;  %p2418_p12 = pnand %p2417_p11, %p2411_p8 }
  0x9d   :  { %v189_v43 = vld [vmem:[#allocation8 + $0x120] sm:$0xff]  ;;  %1983 = vmatpush1.bf16.msra.mxu1 %v1982_v36  ;;  %v1986_v47 = vpack.c.bf16 %v175_v40, %v171_v39  ;;  %v180_v48 = vld [vmem:[#allocation8 + $0xd8] sm:$0xff]  ;;  %v198_v50 = vld [vmem:[#allocation8 + $0x168] sm:$0xff] }
  0x9e   :  { %v184_v49 = vld [vmem:[#allocation8 + $0xf8] sm:$0xff]  ;;  %1985 = vmatprep.subr.bf16.mxu1 %v1984_v44  ;;  %v179_v52 = vld [vmem:[#allocation8 + $0xd0] sm:$0xff]  ;;  %v1930_v54 = vpack.c.bf16 %v189_v43, %v185_v42  ;;  %v1932_v57 = vpack.c.bf16 %v198_v50, %v194_v46  ;;  %v193_v58 = vld [vmem:[#allocation8 + $0x140] sm:$0xff] }
  0x9f   :  { %1923 = vmatpush1.bf16.msra.mxu0 %v1922_v25  ;;  %v1988_v51 = vpack.c.bf16 %v184_v49, %v180_v48  ;;  %v183_v53 = vld [vmem:[#allocation8 + $0xf0] sm:$0xff]  ;;  %v188_v55 = vld [vmem:[#allocation8 + $0x118] sm:$0xff]  ;;  %v197_v59 = vld [vmem:[#allocation8 + $0x160] sm:$0xff] }
  0xa0   :  { %1925 = vmatprep.subr.bf16.mxu0 %v1924_v29  ;;  %v192_v56 = vld [vmem:[#allocation8 + $0x138] sm:$0xff]  ;;  %v202_v60 = vld [vmem:[#allocation8 + $0x188] sm:$0xff]  ;;  %v1990_v61 = vpack.c.bf16 %v183_v53, %v179_v52  ;;  %v187_v0 = vld [vmem:[#allocation8 + $0x110] sm:$0xff]  ;;  %v1934_v4 = vpack.c.bf16 %v197_v59, %v193_v58 }
  0xa1   :  { %1987 = vmatpush1.bf16.msra.mxu1 %v1986_v47  ;;  %v206_v62 = vld [vmem:[#allocation8 + $0x1a8] sm:$0xff]  ;;  %v1992_v63 = vpack.c.bf16 %v192_v56, %v188_v55  ;;  %v191_v1 = vld [vmem:[#allocation8 + $0x130] sm:$0xff]  ;;  %v196_v2 = vld [vmem:[#allocation8 + $0x158] sm:$0xff] }
  0xa2   :  { %1989 = vmatprep.subr.bf16.mxu1 %v1988_v51  ;;  %v200_v3 = vld [vmem:[#allocation8 + $0x178] sm:$0xff]  ;;  %v1936_v5 = vpack.c.bf16 %v206_v62, %v202_v60  ;;  %v201_v6 = vld [vmem:[#allocation8 + $0x180] sm:$0xff]  ;;  %v210_v8 = vld [vmem:[#allocation8 + $0x1c8] sm:$0xff]  ;;  %v1994_v9 = vpack.c.bf16 %v191_v1, %v187_v0 }
  0xa3   :  { %1927 = vmatpush1.bf16.msra.mxu0 %v1926_v41  ;;  %v205_v7 = vld [vmem:[#allocation8 + $0x1a0] sm:$0xff]  ;;  %v214_v10 = vld [vmem:[#allocation8 + $0x1e8] sm:$0xff]  ;;  %v1996_v11 = vpack.c.bf16 %v200_v3, %v196_v2  ;;  %v195_v12 = vld [vmem:[#allocation8 + $0x150] sm:$0xff] }
  0xa4   :  { %1929 = vmatprep.subr.bf16.mxu0 %v1928_v45  ;;  %v199_v13 = vld [vmem:[#allocation8 + $0x170] sm:$0xff]  ;;  %v204_v14 = vld [vmem:[#allocation8 + $0x198] sm:$0xff]  ;;  %v1938_v16 = vpack.c.bf16 %v205_v7, %v201_v6  ;;  %v1940_v17 = vpack.c.bf16 %v214_v10, %v210_v8  ;;  %v209_v18 = vld [vmem:[#allocation8 + $0x1c0] sm:$0xff] }
  0xa5   :  { %1991 = vmatpush1.bf16.msra.mxu1 %v1990_v61  ;;  %v208_v15 = vld [vmem:[#allocation8 + $0x1b8] sm:$0xff]  ;;  %v213_v19 = vld [vmem:[#allocation8 + $0x1e0] sm:$0xff]  ;;  %v218_v20 = vld [vmem:[#allocation8 + $0x208] sm:$0xff]  ;;  %v1998_v21 = vpack.c.bf16 %v199_v13, %v195_v12 }
  0xa6   :  { %1993 = vmatprep.subr.bf16.mxu1 %v1992_v63  ;;  %v222_v22 = vld [vmem:[#allocation8 + $0x228] sm:$0xff]  ;;  %v2000_v23 = vpack.c.bf16 %v208_v15, %v204_v14  ;;  %v203_v24 = vld [vmem:[#allocation8 + $0x190] sm:$0xff]  ;;  %v212_v26 = vld [vmem:[#allocation8 + $0x1d8] sm:$0xff]  ;;  %v1942_v28 = vpack.c.bf16 %v213_v19, %v209_v18 }
  0xa7   :  { %1931 = vmatpush1.bf16.msra.mxu0 %v1930_v54  ;;  %v207_v25 = vld [vmem:[#allocation8 + $0x1b0] sm:$0xff]  ;;  %v216_v27 = vld [vmem:[#allocation8 + $0x1f8] sm:$0xff]  ;;  %v1944_v29 = vpack.c.bf16 %v222_v22, %v218_v20  ;;  %v217_v30 = vld [vmem:[#allocation8 + $0x200] sm:$0xff] }
  0xa8   :  { %1933 = vmatprep.subr.bf16.mxu0 %v1932_v57  ;;  %v221_v31 = vld [vmem:[#allocation8 + $0x220] sm:$0xff]  ;;  %v226_v32 = vld [vmem:[#allocation8 + $0x248] sm:$0xff]  ;;  %v2002_v33 = vpack.c.bf16 %v207_v25, %v203_v24  ;;  %v2004_v35 = vpack.c.bf16 %v216_v27, %v212_v26  ;;  %v211_v36 = vld [vmem:[#allocation8 + $0x1d0] sm:$0xff] }
  0xa9   :  { %1995 = vmatpush1.bf16.msra.mxu1 %v1994_v9  ;;  %v230_v34 = vld [vmem:[#allocation8 + $0x268] sm:$0xff]  ;;  %v215_v37 = vld [vmem:[#allocation8 + $0x1f0] sm:$0xff]  ;;  %v220_v38 = vld [vmem:[#allocation8 + $0x218] sm:$0xff]  ;;  %v1946_v40 = vpack.c.bf16 %v221_v31, %v217_v30 }
  0xaa   :  { %1997 = vmatprep.subr.bf16.mxu1 %v1996_v11  ;;  %v224_v39 = vld [vmem:[#allocation8 + $0x238] sm:$0xff]  ;;  %v1948_v41 = vpack.c.bf16 %v230_v34, %v226_v32  ;;  %v225_v42 = vld [vmem:[#allocation8 + $0x240] sm:$0xff]  ;;  %v234_v44 = vld [vmem:[#allocation8 + $0x288] sm:$0xff]  ;;  %v2006_v45 = vpack.c.bf16 %v215_v37, %v211_v36 }
  0xab   :  { %1935 = vmatpush1.bf16.msra.mxu0 %v1934_v4  ;;  %v229_v43 = vld [vmem:[#allocation8 + $0x260] sm:$0xff]  ;;  %v238_v46 = vld [vmem:[#allocation8 + $0x2a8] sm:$0xff]  ;;  %v2008_v47 = vpack.c.bf16 %v224_v39, %v220_v38  ;;  %v219_v48 = vld [vmem:[#allocation8 + $0x210] sm:$0xff] }
  0xac   :  { %1937 = vmatprep.subr.bf16.mxu0 %v1936_v5  ;;  %v223_v49 = vld [vmem:[#allocation8 + $0x230] sm:$0xff]  ;;  %v228_v50 = vld [vmem:[#allocation8 + $0x258] sm:$0xff]  ;;  %v1950_v52 = vpack.c.bf16 %v229_v43, %v225_v42  ;;  %v233_v53 = vld [vmem:[#allocation8 + $0x280] sm:$0xff]  ;;  %v1952_v54 = vpack.c.bf16 %v238_v46, %v234_v44 }
  0xad   :  { %1999 = vmatpush1.bf16.msra.mxu1 %v1998_v21  ;;  %v232_v51 = vld [vmem:[#allocation8 + $0x278] sm:$0xff]  ;;  %v237_v55 = vld [vmem:[#allocation8 + $0x2a0] sm:$0xff]  ;;  %v242_v56 = vld [vmem:[#allocation8 + $0x2c8] sm:$0xff]  ;;  %v2010_v58 = vpack.c.bf16 %v223_v49, %v219_v48 }
  0xae   :  { %2001 = vmatprep.subr.bf16.mxu1 %v2000_v23  ;;  %v246_v57 = vld [vmem:[#allocation8 + $0x2e8] sm:$0xff]  ;;  %v2012_v59 = vpack.c.bf16 %v232_v51, %v228_v50  ;;  %v227_v60 = vld [vmem:[#allocation8 + $0x250] sm:$0xff]  ;;  %v236_v63 = vld [vmem:[#allocation8 + $0x298] sm:$0xff]  ;;  %v1954_v1 = vpack.c.bf16 %v237_v55, %v233_v53 }
  0xaf   :  { %1939 = vmatpush1.bf16.msra.mxu0 %v1938_v16  ;;  %v231_v61 = vld [vmem:[#allocation8 + $0x270] sm:$0xff]  ;;  %v240_v0 = vld [vmem:[#allocation8 + $0x2b8] sm:$0xff]  ;;  %v1956_v2 = vpack.c.bf16 %v246_v57, %v242_v56  ;;  %v241_v3 = vld [vmem:[#allocation8 + $0x2c0] sm:$0xff] }
  0xb0   :  { %1941 = vmatprep.subr.bf16.mxu0 %v1940_v17  ;;  %v152_v62 = vld [vmem:[#allocation2 + $0x8] sm:$0xff]  ;;  %v245_v4 = vld [vmem:[#allocation8 + $0x2e0] sm:$0xff]  ;;  %v250_v5 = vld [vmem:[#allocation8 + $0x308] sm:$0xff]  ;;  %v2014_v6 = vpack.c.bf16 %v231_v61, %v227_v60  ;;  %v2016_v8 = vpack.c.bf16 %v240_v0, %v236_v63 }
  0xb1   :  { %2003 = vmatpush1.bf16.msra.mxu1 %v2002_v33  ;;  %367 = vmatprep.mubr.f32.mxu0 %v152_v62  ;;  %v254_v7 = vld [vmem:[#allocation8 + $0x328] sm:$0xff]  ;;  %v235_v9 = vld [vmem:[#allocation8 + $0x290] sm:$0xff]  ;;  %v244_v11 = vld [vmem:[#allocation8 + $0x2d8] sm:$0xff]  ;;  %v1958_v13 = vpack.c.bf16 %v245_v4, %v241_v3 }
  0xb2   :  { %2005 = vmatprep.subr.bf16.mxu1 %v2004_v35  ;;  %438 = vmatprep.mubr.f32.mxu1 %v152_v62  ;;  %v239_v10 = vld [vmem:[#allocation8 + $0x2b0] sm:$0xff]  ;;  %v248_v12 = vld [vmem:[#allocation8 + $0x2f8] sm:$0xff]  ;;  %v1960_v14 = vpack.c.bf16 %v254_v7, %v250_v5  ;;  %v249_v15 = vld [vmem:[#allocation8 + $0x300] sm:$0xff]  ;;  %v3154_v5 = vmov 0.0|0.0  }
  0xb3   :  { %1943 = vmatpush1.bf16.msra.mxu0 %v1942_v28  ;;  %v253_v16 = vld [vmem:[#allocation8 + $0x320] sm:$0xff]  ;;  %v258_v17 = vld [vmem:[#allocation8 + $0x348] sm:$0xff]  ;;  %v2018_v18 = vpack.c.bf16 %v239_v10, %v235_v9  ;;  %v2020_v20 = vpack.c.bf16 %v248_v12, %v244_v11  ;;  %v243_v21 = vld [vmem:[#allocation8 + $0x2d0] sm:$0xff] }
  0xb4   :  { %1945 = vmatprep.subr.bf16.mxu0 %v1944_v29  ;;  %v262_v19 = vld [vmem:[#allocation8 + $0x368] sm:$0xff]  ;;  %v247_v22 = vld [vmem:[#allocation8 + $0x2f0] sm:$0xff]  ;;  %v252_v23 = vld [vmem:[#allocation8 + $0x318] sm:$0xff]  ;;  %v1962_v25 = vpack.c.bf16 %v253_v16, %v249_v15 }
  0xb5   :  { %2007 = vmatpush1.bf16.msra.mxu1 %v2006_v45  ;;  %v256_v24 = vld [vmem:[#allocation8 + $0x338] sm:$0xff]  ;;  %v1964_v26 = vpack.c.bf16 %v262_v19, %v258_v17  ;;  %v257_v27 = vld [vmem:[#allocation8 + $0x340] sm:$0xff]  ;;  %v266_v29 = vld [vmem:[#allocation8 + $0x388] sm:$0xff]  ;;  %v2022_v30 = vpack.c.bf16 %v247_v22, %v243_v21 }
  0xb6   :  { %2009 = vmatprep.subr.bf16.mxu1 %v2008_v47  ;;  %v261_v28 = vld [vmem:[#allocation8 + $0x360] sm:$0xff]  ;;  %v270_v31 = vld [vmem:[#allocation8 + $0x3a8] sm:$0xff]  ;;  %v2024_v32 = vpack.c.bf16 %v256_v24, %v252_v23  ;;  %v251_v33 = vld [vmem:[#allocation8 + $0x310] sm:$0xff]  ;;  %v3153_v24 = vmov 0.0  }
  0xb7   :  { %1947 = vmatpush1.bf16.msra.mxu0 %v1946_v40  ;;  %v255_v34 = vld [vmem:[#allocation8 + $0x330] sm:$0xff]  ;;  %v260_v35 = vld [vmem:[#allocation8 + $0x358] sm:$0xff]  ;;  %v1966_v37 = vpack.c.bf16 %v261_v28, %v257_v27  ;;  %v1968_v38 = vpack.c.bf16 %v270_v31, %v266_v29  ;;  %v265_v39 = vld [vmem:[#allocation8 + $0x380] sm:$0xff]  ;;  %v283_v28 = vlaneseq }
  0xb8   :  { %1949 = vmatprep.subr.bf16.mxu0 %v1948_v41  ;;  %v264_v36 = vld [vmem:[#allocation8 + $0x378] sm:$0xff]  ;;  %v269_v40 = vld [vmem:[#allocation8 + $0x3a0] sm:$0xff]  ;;  %v274_v41 = vld [vmem:[#allocation8 + $0x3c8] sm:$0xff]  ;;  %v2026_v42 = vpack.c.bf16 %v255_v34, %v251_v33 }
  0xb9   :  { %2011 = vmatpush1.bf16.msra.mxu1 %v2010_v58  ;;  %v278_v43 = vld [vmem:[#allocation8 + $0x3e8] sm:$0xff]  ;;  %v2028_v44 = vpack.c.bf16 %v264_v36, %v260_v35  ;;  %v259_v45 = vld [vmem:[#allocation8 + $0x350] sm:$0xff]  ;;  %v268_v47 = vld [vmem:[#allocation8 + $0x398] sm:$0xff]  ;;  %v1970_v49 = vpack.c.bf16 %v269_v40, %v265_v39  ;;  %v2731_v29 = vshrl.u32 %v283_v28, 7 }
  0xba   :  { %2013 = vmatprep.subr.bf16.mxu1 %v2012_v59  ;;  %v263_v46 = vld [vmem:[#allocation8 + $0x370] sm:$0xff]  ;;  %v272_v48 = vld [vmem:[#allocation8 + $0x3b8] sm:$0xff]  ;;  %v1972_v50 = vpack.c.bf16 %v278_v43, %v274_v41  ;;  %v273_v51 = vld [vmem:[#allocation8 + $0x3c0] sm:$0xff] }
  0xbb   :  { %1951 = vmatpush1.bf16.msra.mxu0 %v1950_v52  ;;  %v277_v52 = vld [vmem:[#allocation8 + $0x3e0] sm:$0xff]  ;;  %v2030_v53 = vpack.c.bf16 %v263_v46, %v259_v45  ;;  %v267_v55 = vld [vmem:[#allocation8 + $0x390] sm:$0xff]  ;;  %v276_v57 = vld [vmem:[#allocation8 + $0x3d8] sm:$0xff]  ;;  %v2745_v35 = vsub.s32 3, %v2731_v29  ;;  %v2749_v43 = vsub.s32 2, %v2731_v29 }
  0xbc   :  { %1953 = vmatprep.subr.bf16.mxu0 %v1952_v54  ;;  %v2032_v54 = vpack.c.bf16 %v272_v48, %v268_v47  ;;  %v271_v56 = vld [vmem:[#allocation8 + $0x3b0] sm:$0xff]  ;;  %v280_v58 = vld [vmem:[#allocation8 + $0x3f8] sm:$0xff]  ;;  %v1974_v59 = vpack.c.bf16 %v277_v52, %v273_v51  ;;  %v151_v0 = vld [vmem:[#allocation2] sm:$0xff] }
  0xbd   :  { %2015 = vmatpush1.bf16.msra.mxu1 %v2014_v6  ;;  %v2034_v60 = vpack.c.bf16 %v271_v56, %v267_v55  ;;  %v2036_v61 = vpack.c.bf16 %v280_v58, %v276_v57  ;;  %v275_v62 = vld [vmem:[#allocation8 + $0x3d0] sm:$0xff]  ;;  %v489_v3 = vld [vmem:[#allocation10 + $0x8] sm:$0xff]  ;;  %v491_v7 = vld [vmem:[#allocation10 + $0x18] sm:$0xff] }
  0xbe   :  { %2017 = vmatprep.subr.bf16.mxu1 %v2016_v8  ;;  %v279_v63 = vld [vmem:[#allocation8 + $0x3f0] sm:$0xff]  ;;  %v492_v9 = vld [vmem:[#allocation10 + $0x20] sm:$0xff]  ;;  %v493_v10 = vld [vmem:[#allocation10 + $0x28] sm:$0xff] }
  0xbf   :  { %1955 = vmatpush1.bf16.msra.mxu0 %v1954_v1  ;;  %v2038_v1 = vpack.c.bf16 %v279_v63, %v275_v62  ;;  %v490_v6 = vld [vmem:[#allocation10 + $0x10] sm:$0xff]  ;;  %v2047_v11 = vpack.c.bf16 %v493_v10, %v492_v9  ;;  %v496_v15 = vld [vmem:[#allocation10 + $0x40] sm:$0xff]  ;;  %v497_v16 = vld [vmem:[#allocation10 + $0x48] sm:$0xff] }
  0xc0   :  { %1957 = vmatprep.subr.bf16.mxu0 %v1956_v2  ;;  %v488_v2 = vld [vmem:[#allocation10] sm:$0xff]  ;;  %v2044_v8 = vpack.c.bf16 %v491_v7, %v490_v6  ;;  %v494_v12 = vld [vmem:[#allocation10 + $0x30] sm:$0xff]  ;;  %v2053_v17 = vpack.c.bf16 %v497_v16, %v496_v15  ;;  %v499_v19 = vld [vmem:[#allocation10 + $0x58] sm:$0xff] }
  0xc1   :  { %2019 = vmatpush1.bf16.msra.mxu1 %v2018_v18  ;;  %v2041_v4 = vpack.c.bf16 %v489_v3, %v488_v2  ;;  %v498_v18 = vld [vmem:[#allocation10 + $0x50] sm:$0xff]  ;;  %v500_v21 = vld [vmem:[#allocation10 + $0x60] sm:$0xff]  ;;  %v501_v22 = vld [vmem:[#allocation10 + $0x68] sm:$0xff] }
  0xc2   :  { %2021 = vmatprep.subr.bf16.mxu1 %v2020_v20  ;;  %v2056_v20 = vpack.c.bf16 %v499_v19, %v498_v18  ;;  %v2059_v23 = vpack.c.bf16 %v501_v22, %v500_v21  ;;  %v281_v31 = vld [vmem:[%s3142_s4] sm:$0xf]  ;;  %v464_v56 = vld [vmem:[#allocation5] sm:$0xff]  ;;  %v1391_v63 = vld [vmem:[#allocation11] sm:$0xff] }
  0xc3   :  { %1959 = vmatpush1.bf16.msra.mxu0 %v1958_v13  ;;  %v495_v13 = vld [vmem:[#allocation10 + $0x38] sm:$0xff]  ;;  %v298_v41 = vrot.slane %v281_v31, %v2745_v35  ;;  %v294_v47 = vrot.slane %v281_v31, %v2749_v43  ;;  %v1393_v7 = vld [vmem:[#allocation11 + $0x10] sm:$0xff]  ;;  %v1400_v18 = vld [vmem:[#allocation11 + $0x48] sm:$0xff] }
  0xc4   :  { %1961 = vmatprep.subr.bf16.mxu0 %v1960_v14  ;;  %v2050_v14 = vpack.c.bf16 %v495_v13, %v494_v12  ;;  %v1396_v12 = vld [vmem:[#allocation11 + $0x28] sm:$0xff]  ;;  %v1398_v15 = vld [vmem:[#allocation11 + $0x38] sm:$0xff] }
  0xc5   :  { %2023 = vmatpush1.bf16.msra.mxu1 %v2022_v30  ;;  %v2734_v30 = vsub.s32 0, %v2731_v29  ;;  %v1402_v21 = vld [vmem:[#allocation11 + $0x58] sm:$0xff] }
  0xc6   :  { %2025 = vmatprep.subr.bf16.mxu1 %v2024_v32  ;;  %v2740_v32 = vsub.s32 1, %v2731_v29 }
  0xc7   :  { %1963 = vmatpush1.bf16.msra.mxu0 %v1962_v25  ;;  %v502_v25 = vld [vmem:[#allocation10 + $0x70] sm:$0xff]  ;;  %v286_v33 = vrot.slane %v281_v31, %v2734_v30 }
  0xc8   :  { %1965 = vmatprep.subr.bf16.mxu0 %v1964_v26  ;;  %v503_v26 = vld [vmem:[#allocation10 + $0x78] sm:$0xff]  ;;  %v290_v34 = vrot.slane %v281_v31, %v2740_v32 }
  0xc9   :  { %2027 = vmatpush1.bf16.msra.mxu1 %v2026_v42  ;;  %v2062_v27 = vpack.c.bf16 %v503_v26, %v502_v25  ;;  %v1404_v25 = vld [vmem:[#allocation11 + $0x68] sm:$0xff]  ;;  %v1406_v31 = vld [vmem:[#allocation11 + $0x78] sm:$0xff] }
  0xca   :  { %2029 = vmatprep.subr.bf16.mxu1 %v2028_v44 }
  0xcb   :  { %1967 = vmatpush1.bf16.msra.mxu0 %v1966_v37 }
  0xcc   :  { %1969 = vmatprep.subr.bf16.mxu0 %v1968_v38 }
  0xcd   :  { %2031 = vmatpush1.bf16.msra.mxu1 %v2030_v53 }
  0xce   :  { %2033 = vmatprep.subr.bf16.mxu1 %v2032_v54 }
  0xcf   :  { %1971 = vmatpush1.bf16.msra.mxu0 %v1970_v49 }
  0xd0   :  { %1973 = vmatprep.subr.bf16.mxu0 %v1972_v50 }
  0xd1   :  { %2035 = vmatpush1.bf16.msra.mxu1 %v2034_v60 }
  0xd2   :  { %2037 = vmatprep.subr.bf16.mxu1 %v2036_v61 }
  0xd3   :  { %1975 = vmatpush1.bf16.msra.mxu0 %v1974_v59 }
  0xd4   :  { %2040 = vmatprep.subr.bf16.mxu0 %v3154_v5 }
  0xd5   :  { %2039 = vmatpush1.bf16.msra.mxu1 %v2038_v1 }
  0xd6   :  { %368 = vmatmul.mubr.f32.vlgmr.msra.gmra.mrb[0].mxu0 %v151_v0  ;;  %2064 = vmatprep.subr.bf16.mxu1 %v3154_v5 }
  0xd7   :  { %2042 = vmatpush3.bf16.msra.mxu0 %v2041_v4  ;;  %1839 = vmatprep.mubr.msk.f32.mxu0 %vm2505_vm0, %v3153_v24  ;;  %v1754_v4 = vld [vmem:[%s3144_s6] ss:$0 sm:$0xff] }
  0xd8   :  { %439 = vmatmul.mubr.f32.vlgmr.msra.gmra.mrb[0].mxu1 %v151_v0  ;;  %2043 = vmatprep.subr.bf16.mxu0 %v3154_v5  ;;  %v1392_v0 = vld [vmem:[#allocation11 + $0x8] sm:$0xff] }
  0xd9   :  { %1874 = vmatprep.mubr.msk.f32.mxu1 %vm2505_vm0, %v3153_v24  ;;  %v2089_v3 = vpack.c.bf16 %v1392_v0, %v1391_v63 }
  0xdb   :  { %2045 = vmatpush3.bf16.msra.mxu0 %v2044_v8  ;;  %v1394_v8 = vld [vmem:[#allocation11 + $0x18] sm:$0xff] }
  0xdc   :  { %2046 = vmatprep.subr.bf16.mxu0 %v3154_v5  ;;  %v2092_v10 = vpack.c.bf16 %v1394_v8, %v1393_v7 }
  0xdf   :  { %2048 = vmatpush3.bf16.msra.mxu0 %v2047_v11  ;;  %v1395_v11 = vld [vmem:[#allocation11 + $0x20] sm:$0xff] }
  0xe0   :  { %2049 = vmatprep.subr.bf16.mxu0 %v3154_v5  ;;  %v2095_v13 = vpack.c.bf16 %v1396_v12, %v1395_v11  ;;  %v2794_v11 = vld [vmem:[#allocation7 + $0x38] sm:$0xff]  ;;  %v2796_v12 = vld [vmem:[#allocation7 + $0x30] sm:$0xff] }
  0xe3   :  { %2051 = vmatpush3.bf16.msra.mxu0 %v2050_v14  ;;  %v1397_v14 = vld [vmem:[#allocation11 + $0x30] sm:$0xff] }
  0xe4   :  { %2052 = vmatprep.subr.bf16.mxu0 %v3154_v5  ;;  %v2098_v16 = vpack.c.bf16 %v1398_v15, %v1397_v14 }
  0xe7   :  { %2054 = vmatpush3.bf16.msra.mxu0 %v2053_v17  ;;  %v1399_v17 = vld [vmem:[#allocation11 + $0x40] sm:$0xff] }
  0xe8   :  { %2055 = vmatprep.subr.bf16.mxu0 %v3154_v5  ;;  %v2101_v19 = vpack.c.bf16 %v1400_v18, %v1399_v17  ;;  %v2801_v17 = vld [vmem:[#allocation7 + $0x58] sm:$0xff]  ;;  %v2803_v18 = vld [vmem:[#allocation7 + $0x50] sm:$0xff] }
  0xeb   :  { %2057 = vmatpush3.bf16.msra.mxu0 %v2056_v20  ;;  %v1401_v20 = vld [vmem:[#allocation11 + $0x50] sm:$0xff] }
  0xec   :  { %2058 = vmatprep.subr.bf16.mxu0 %v3154_v5  ;;  %v2104_v22 = vpack.c.bf16 %v1402_v21, %v1401_v20 }
  0xef   :  { %2060 = vmatpush3.bf16.msra.mxu0 %v2059_v23  ;;  %v1403_v23 = vld [vmem:[#allocation11 + $0x60] sm:$0xff] }
  0xf0   :  { %2061 = vmatprep.subr.bf16.mxu0 %v3154_v5  ;;  %v2107_v26 = vpack.c.bf16 %v1404_v25, %v1403_v23  ;;  %v2808_v25 = vld [vmem:[#allocation7 + $0x68] sm:$0xff] }
  0xf3   :  { %2063 = vmatpush3.bf16.msra.mxu0 %v2062_v27  ;;  %v1405_v27 = vld [vmem:[#allocation11 + $0x70] sm:$0xff] }
  0xf4   :  { %2088 = vmatprep.subr.bf16.mxu0 %v3154_v5 }
 0x1a9   :  { %v369_v36 = vpop.f32.mrb[0].mxu0 }
 0x1aa   :  { %v370_v37 = vadd.f32 %v369_v36, %v286_v33  ;;  %v371_v38 = vpop.f32.mrb[1].mxu0  ;;  %v2110_v33 = vpack.c.bf16 %v1406_v31, %v1405_v27 }
 0x1ab   :  { %v372_v39 = vadd.f32 %v371_v38, %v290_v34  ;;  %v440_v44 = vpop.f32.mrb[0].mxu1  ;;  %v2507_v34 = vmov 1966171168  }
 0x1ac   :  { %v1751_v40 = vmul.f32 -1.442695, %v370_v37  ;;  %v442_v45 = vpop.f32.mrb[1].mxu1  ;;  %v441_v49 = vadd.f32 %v440_v44, %v294_v47  ;;  %v587_v36 = vunpack.c.l.s4 %v2507_v34  ;;  %v2767_v47 = vld [vmem:[#allocation7] sm:$0xff] }
 0x1ad   :  { %v1752_v42 = vmul.f32 -1.442695, %v372_v39  ;;  %v443_v46 = vadd.f32 %v442_v45, %v298_v41 }
 0x1ae   :  { %2168 = vpow2.f32 %v1751_v40  ;;  %v588_v37 = vunpack.c.0.s8 %v587_v36  ;;  %v2817_v36 = vld [vmem:[#allocation7 + $0x78] sm:$0xff] }
 0x1af   :  { %2170 = vpow2.f32 %v1752_v42  ;;  %v1753_v48 = vmul.f32 -1.442695, %v443_v46  ;;  %v2765_v46 = vld [vmem:[#allocation7 + $0x8] sm:$0xff]  ;;  %3159 = vst [vmem:[#allocation28_spill] sm:$0xff] %v2817_v36 }
 0x1b0   :  { %v591_v38 = vsub.s32 %v588_v37, %v2731_v29  ;;  %v2819_v37 = vld [vmem:[#allocation7 + $0x70] sm:$0xff] }
 0x1b1   :  { %2172 = vpow2.f32 %v1753_v48  ;;  %3160 = vst [vmem:[#allocation29_spill] sm:$0xff] %v2819_v37 }
 0x1b2   :  { %2174 = vtanh.f32 %v441_v49 }
 0x1b8   :  { %v2169_v50 = vpop.eup %2168 }
 0x1b9   :  { %v2171_v51 = vpop.eup %2170  ;;  %v448_v52 = vadd.f32 1.0, %v2169_v50 }
 0x1ba   :  { %v454_v53 = vadd.f32 1.0, %v2171_v51 }
 0x1bb   :  { %2176 = vrcp.f32 %v448_v52  ;;  %v2173_v54 = vpop.eup %2172 }
 0x1bc   :  { %2178 = vrcp.f32 %v454_v53  ;;  %v2175_v55 = vpop.eup %2174  ;;  %v461_v58 = vadd.f32 1.0, %v2173_v54 }
 0x1be   :  { %2180 = vrcp.f32 %v461_v58 }
 0x1c5   :  { %v2177_v57 = vpop.eup %2176 }
 0x1c6   :  { %v2179_v59 = vpop.eup %2178  ;;  %v466_v60 = vmul.f32 %v2177_v57, %v2175_v55  ;;  %v2773_v55 = vld [vmem:[#allocation7 + $0x18] sm:$0xff] }
 0x1c7   :  { %v465_v61 = vmul.f32 %v2179_v59, %v464_v56  ;;  %v2775_v56 = vld [vmem:[#allocation7 + $0x10] sm:$0xff] }
 0x1c8   :  { %v2181_v1 = vpop.eup %2180 }
 0x1c9   :  { %v467_v62 = vadd.f32 %v466_v60, %v465_v61  ;;  %v2780_v61 = vld [vmem:[#allocation7 + $0x28] sm:$0xff] }
 0x1cb   :  { %2182 = vtanh.f32 %v467_v62  ;;  %471 = vst [vmem:[#allocation19] sm:$0xff] %v467_v62  ;;  %v2782_v62 = vld [vmem:[#allocation7 + $0x20] sm:$0xff] }
 0x1d5   :  { %v2183_v2 = vpop.eup %2182 }
 0x1d6   :  { %v469_v6 = vmul.f32 %v2183_v2, %v2181_v1 }
 0x1d8   :  { %1840 = vmatmul.mubr.f32.vlgmr.msra.gmra.mrb[2].mxu0 %v469_v6  ;;  %470 = vst [vmem:[#allocation17] sm:$0xff] %v469_v6  ;;  %v581_v9 = vmul.f32 %v1754_v4, %v469_v6  ;;  %v2787_v4 = vld [vmem:[#allocation7 + $0x48] sm:$0xff] }
 0x1d9   :  { %2090 = vmatpush3.bf16.msra.mxu0 %v2089_v3  ;;  %1909 = vmatprep.mubr.msk.f32.mxu0 %vm2505_vm0, %v3153_v24 }
 0x1da   :  { %582 = vadd.xlane.f32.xlu0 %v581_v9  ;;  %2091 = vmatprep.subr.bf16.mxu0 %v3154_v5 }
 0x1dd   :  { %2093 = vmatpush3.bf16.msra.mxu0 %v2092_v10 }
 0x1de   :  { %2094 = vmatprep.subr.bf16.mxu0 %v3154_v5 }
 0x1e1   :  { %2096 = vmatpush3.bf16.msra.mxu0 %v2095_v13 }
 0x1e2   :  { %2097 = vmatprep.subr.bf16.mxu0 %v3154_v5 }
 0x1e5   :  { %2099 = vmatpush3.bf16.msra.mxu0 %v2098_v16 }
 0x1e6   :  { %2100 = vmatprep.subr.bf16.mxu0 %v3154_v5 }
 0x1e9   :  { %2102 = vmatpush3.bf16.msra.mxu0 %v2101_v19  ;;  %v2508_v19 = vmov 0  }
 0x1ea   :  { %2103 = vmatprep.subr.bf16.mxu0 %v3154_v5  ;;  %2167 = vset.pattern.permute.xlu0 %v2508_v19 }
 0x1eb   :  { %2166 = vset.pattern.permute.xlu1 %v2508_v19  ;;  %v2863_v19 = vsub.s32 7, %v2731_v29 }
 0x1ed   :  { %2105 = vmatpush3.bf16.msra.mxu0 %v2104_v22 }
 0x1ee   :  { %2106 = vmatprep.subr.bf16.mxu0 %v3154_v5 }
 0x1f1   :  { %2108 = vmatpush3.bf16.msra.mxu0 %v2107_v26  ;;  %v2810_v26 = vld [vmem:[#allocation7 + $0x60] sm:$0xff] }
 0x1f2   :  { %2109 = vmatprep.subr.bf16.mxu0 %v3154_v5 }
 0x1f5   :  { %2111 = vmatpush3.bf16.msra.mxu0 %v2110_v33 }
 0x1f8   :  { %1910 = vmatmul.mubr.f32.vlgmr.msra.gmra.mrb[4].mxu0 %v469_v6  ;;  %v2789_v6 = vld [vmem:[#allocation7 + $0x40] sm:$0xff] }
 0x2ab   :  { %v570_v39 = vpop.f32.mrb[2].mxu0 }
 0x2ac   :  { %v592_v40 = vrot.slane %v570_v39, %v591_v38  ;;  %v1841_v41 = vpop.f32.mrb[3].mxu0  ;;  %v585_v42 = vcombine.high %v570_v39, %v570_v39 }
 0x2ad   :  { %v583_v41 = vpop.xlane.xlu0 %582 }
 0x2ae   :  { %v600_v44 = vcombine.high %v592_v40, %v592_v40  ;;  %v608_v45 = vrot.slane %v592_v40, %v591_v38  ;;  %v599_v50 = vrot.slane %v585_v42, %v591_v38  ;;  %v726_v42 = vrot.slane %v583_v41, %v2734_v30 }
 0x2b0   :  { %v637_v48 = vrot.slane %v608_v45, %v2734_v30  ;;  %v622_v49 = vrot.slane %v600_v44, %v591_v38  ;;  %v630_v54 = vcombine.high %v608_v45, %v608_v45  ;;  %v615_v60 = vrot.slane %v599_v50, %v591_v38 }
 0x2b1   :  { %v601_v63 = vcombine.high %v599_v50, %v599_v50  ;;  %v730_v50 = vrot.slane %v583_v41, %v2740_v32 }
 0x2b2   :  { %v675_v51 = vmul.f32 %v637_v48, %v2765_v46  ;;  %v674_v52 = vmul.f32 %v637_v48, %v2767_v47  ;;  %v641_v53 = vrot.slane %v622_v49, %v2734_v30  ;;  %v645_v59 = vrot.slane %v630_v54, %v2734_v30 }
 0x2b3   :  { %v653_v2 = vrot.slane %v615_v60, %v2734_v30  ;;  %v632_v3 = vcombine.high %v622_v49, %v622_v49  ;;  %v629_v10 = vrot.slane %v601_v63, %v591_v38  ;;  %v631_v13 = vcombine.high %v615_v60, %v615_v60 }
 0x2b4   :  { %692 = vadd.xlane.f32.xlu1 %v675_v51  ;;  %690 = vadd.xlane.f32.xlu0 %v674_v52  ;;  %v677_v57 = vmul.f32 %v641_v53, %v2773_v55  ;;  %v676_v58 = vmul.f32 %v641_v53, %v2775_v56  ;;  %v679_v0 = vmul.f32 %v645_v59, %v2780_v61 }
 0x2b5   :  { %v678_v1 = vmul.f32 %v645_v59, %v2782_v62  ;;  %v683_v7 = vmul.f32 %v653_v2, %v2787_v4  ;;  %v682_v8 = vmul.f32 %v653_v2, %v2789_v6  ;;  %v649_v9 = vrot.slane %v632_v3, %v2734_v30 }
 0x2b6   :  { %v657_v16 = vrot.slane %v629_v10, %v2734_v30  ;;  %v661_v22 = vrot.slane %v631_v13, %v2734_v30  ;;  %v633_v23 = vcombine.high %v629_v10, %v629_v10  ;;  %v2853_v10 = vsub.s32 6, %v2731_v29 }
 0x2b7   :  { %v681_v14 = vmul.f32 %v649_v9, %v2794_v11  ;;  %v680_v15 = vmul.f32 %v649_v9, %v2796_v12 }
 0x2b8   :  { %696 = vadd.xlane.f32.xlu0 %v677_v57  ;;  %694 = vadd.xlane.f32.xlu1 %v676_v58  ;;  %v685_v20 = vmul.f32 %v657_v16, %v2801_v17  ;;  %v684_v21 = vmul.f32 %v657_v16, %v2803_v18  ;;  %v687_v27 = vmul.f32 %v661_v22, %v2808_v25 }
 0x2b9   :  { %v686_v31 = vmul.f32 %v661_v22, %v2810_v26  ;;  %v665_v33 = vrot.slane %v633_v23, %v2734_v30  ;;  %v734_v58 = vrot.slane %v583_v41, %v2749_v43  ;;  %v750_v16 = vrot.slane %v583_v41, %v2853_v10 }
 0x2bb   :  { %v689_v39 = vmul.f32 %v665_v33, %v2817_v36  ;;  %v688_v40 = vmul.f32 %v665_v33, %v2819_v37 }
 0x2bc   :  { %700 = vadd.xlane.f32.xlu0 %v679_v0  ;;  %698 = vadd.xlane.f32.xlu1 %v678_v1  ;;  %v2841_v0 = vsub.s32 4, %v2731_v29  ;;  %v2845_v1 = vsub.s32 5, %v2731_v29 }
 0x2be   :  { %v746_v9 = vrot.slane %v583_v41, %v2845_v1 }
 0x2c0   :  { %708 = vadd.xlane.f32.xlu0 %v683_v7  ;;  %706 = vadd.xlane.f32.xlu1 %v682_v8  ;;  %v742_v8 = vrot.slane %v583_v41, %v2841_v0 }
 0x2c4   :  { %704 = vadd.xlane.f32.xlu0 %v681_v14  ;;  %702 = vadd.xlane.f32.xlu1 %v680_v15 }
 0x2c8   :  { %712 = vadd.xlane.f32.xlu0 %v685_v20  ;;  %710 = vadd.xlane.f32.xlu1 %v684_v21 }
 0x2cb   :  { %v2815_v34 = vpop.f32.mrb[4].mxu0 }
 0x2cc   :  { %3158 = vst [vmem:[#allocation27_spill] sm:$0xff] %v2815_v34  ;;  %v1911_v38 = vpop.f32.mrb[5].mxu0  ;;  %716 = vadd.xlane.f32.xlu0 %v687_v27  ;;  %714 = vadd.xlane.f32.xlu1 %v686_v31  ;;  %v738_v27 = vrot.slane %v583_v41, %v2745_v35  ;;  %v754_v31 = vrot.slane %v583_v41, %v2863_v19 }
 0x2d0   :  { %720 = vadd.xlane.f32.xlu0 %v689_v39  ;;  %718 = vadd.xlane.f32.xlu1 %v688_v40 }
 0x341   :  { %v693_v44 = vpop.xlane.xlu1 %692  ;;  %v691_v45 = vpop.xlane.xlu0 %690 }
 0x342   :  { %v2824_v48 = vadd.f32 %v726_v42, %v693_v44  ;;  %v2826_v49 = vadd.f32 %v726_v42, %v691_v45 }
 0x344   :  { %799 = vperm.xlu0 %2167, %v2824_v48   ;;  %796 = vperm.xlu1 %2166, %v2826_v49  }
 0x345   :  { %v695_v51 = vpop.xlane.xlu1 %694  ;;  %v697_v53 = vpop.xlane.xlu0 %696 }
 0x346   :  { %v2831_v52 = vadd.f32 %v730_v50, %v695_v51  ;;  %v2834_v57 = vadd.f32 %v730_v50, %v697_v53 }
 0x348   :  { %802 = vperm.xlu1 %2166, %v2831_v52  }
 0x349   :  { %v699_v54 = vpop.xlane.xlu1 %698  ;;  %v701_v59 = vpop.xlane.xlu0 %700 }
 0x34a   :  { %v2838_v63 = vadd.f32 %v734_v58, %v699_v54  ;;  %v2847_v3 = vadd.f32 %v734_v58, %v701_v59 }
 0x34c   :  { %805 = vperm.xlu1 %2166, %v2834_v57  }
 0x34d   :  { %v707_v60 = vpop.xlane.xlu1 %706  ;;  %v709_v7 = vpop.xlane.xlu0 %708 }
 0x34e   :  { %v2855_v14 = vadd.f32 %v742_v8, %v707_v60  ;;  %v2865_v22 = vadd.f32 %v742_v8, %v709_v7  ;;  %v844_v7 = vand.u32 127, %v283_v28 }
 0x350   :  { %808 = vperm.xlu1 %2166, %v2838_v63  }
 0x351   :  { %v703_v2 = vpop.xlane.xlu1 %702  ;;  %v705_v20 = vpop.xlane.xlu0 %704 }
 0x352   :  { %v2873_v38 = vadd.f32 %v738_v27, %v703_v2  ;;  %v2879_v42 = vadd.f32 %v738_v27, %v705_v20  ;;  %v2896_v27 = vsub.s32 %v844_v7, %v2731_v29 }
 0x354   :  { %811 = vperm.xlu1 %2166, %v2847_v3  }
 0x355   :  { %v711_v13 = vpop.xlane.xlu1 %710  ;;  %v713_v40 = vpop.xlane.xlu0 %712 }
 0x356   :  { %v2857_v15 = vadd.f32 %v746_v9, %v711_v13  ;;  %v2882_v45 = vadd.f32 %v746_v9, %v713_v40  ;;  %v849_v13 = vadd.s32 4294967288, %v844_v7 }
 0x358   :  { %826 = vperm.xlu0 %2167, %v2857_v15   ;;  %820 = vperm.xlu1 %2166, %v2855_v14  }
 0x359   :  { %v715_v21 = vpop.xlane.xlu1 %714  ;;  %v717_v44 = vpop.xlane.xlu0 %716 }
 0x35a   :  { %v2867_v23 = vadd.f32 %v750_v16, %v715_v21  ;;  %v2885_v41 = vadd.f32 %v750_v16, %v717_v44  ;;  %v2893_v21 = vsub.s32 %v849_v13, %v2731_v29 }
 0x35c   :  { %832 = vperm.xlu0 %2167, %v2867_v23   ;;  %823 = vperm.xlu1 %2166, %v2865_v22  }
 0x35d   :  { %v719_v33 = vpop.xlane.xlu1 %718  ;;  %v721_v50 = vpop.xlane.xlu0 %720 }
 0x35e   :  { %v2875_v39 = vadd.f32 %v754_v31, %v719_v33  ;;  %v2888_v51 = vadd.f32 %v754_v31, %v721_v50 }
 0x360   :  { %814 = vperm.xlu1 %2166, %v2873_v38   ;;  %838 = vperm.xlu0 %2167, %v2875_v39  }
 0x364   :  { %817 = vperm.xlu1 %2166, %v2879_v42  }
 0x368   :  { %829 = vperm.xlu1 %2166, %v2882_v45  }
 0x36c   :  { %835 = vperm.xlu1 %2166, %v2885_v41  }
 0x370   :  { %841 = vperm.xlu1 %2166, %v2888_v51  }
 0x3c3   :  { %v797_v53 = vpop.permute.xlu1 %796  ;;  %v800_v9 = vpop.permute.xlu0 %799 }
 0x3c4   :  { %v853_v44 = vrot.slane %v800_v9, %v2893_v21  ;;  %v848_v28 = vrot.slane %v797_v53, %v2896_v27 }
 0x3c6   :  { %v855_v7 = vsel %vm854_vm1, %v853_v44, %v848_v28 }
 0x3c7   :  { %v803_v54 = vpop.permute.xlu1 %802 }
 0x3c8   :  { %v859_v50 = vrot.slane %v803_v54, %v2896_v27 }
 0x3cb   :  { %v806_v58 = vpop.permute.xlu1 %805 }
 0x3cc   :  { %v863_v33 = vrot.slane %v806_v58, %v2893_v21 }
 0x3ce   :  { %v864_v29 = vsel %vm854_vm1, %v863_v33, %v859_v50 }
 0x3cf   :  { %v809_v59 = vpop.permute.xlu1 %808  ;;  %v920_v9 = vsel %vm919_vm2, %v864_v29, %v855_v7 }
 0x3d0   :  { %v868_v13 = vrot.slane %v809_v59, %v2896_v27 }
 0x3d3   :  { %v812_v60 = vpop.permute.xlu1 %811 }
 0x3d4   :  { %v872_v40 = vrot.slane %v812_v60, %v2893_v21 }
 0x3d6   :  { %v873_v60 = vsel %vm854_vm1, %v872_v40, %v868_v13 }
 0x3d7   :  { %v821_v2 = vpop.permute.xlu1 %820  ;;  %v827_v20 = vpop.permute.xlu0 %826  ;;  %v922_v37 = vsel %vm921_vm3, %v873_v60, %v920_v9 }
 0x3d8   :  { %v895_v33 = vrot.slane %v827_v20, %v2896_v27  ;;  %v886_v40 = vrot.slane %v821_v2, %v2896_v27 }
 0x3db   :  { %v824_v8 = vpop.permute.xlu1 %823  ;;  %v833_v5 = vpop.permute.xlu0 %832 }
 0x3dc   :  { %v890_v59 = vrot.slane %v824_v8, %v2893_v21  ;;  %v904_v44 = vrot.slane %v833_v5, %v2896_v27 }
 0x3de   :  { %v891_v8 = vsel %vm854_vm1, %v890_v59, %v886_v40 }
 0x3df   :  { %v815_v16 = vpop.permute.xlu1 %814  ;;  %v839_v28 = vpop.permute.xlu0 %838 }
 0x3e0   :  { %v877_v58 = vrot.slane %v815_v16, %v2896_v27  ;;  %v913_v20 = vrot.slane %v839_v28, %v2896_v27 }
 0x3e3   :  { %v818_v31 = vpop.permute.xlu1 %817 }
 0x3e4   :  { %v881_v24 = vrot.slane %v818_v31, %v2893_v21 }
 0x3e6   :  { %v882_v53 = vsel %vm854_vm1, %v881_v24, %v877_v58 }
 0x3e7   :  { %v830_v34 = vpop.permute.xlu1 %829  ;;  %v924_v24 = vsel %vm923_vm4, %v882_v53, %v922_v37 }
 0x3e8   :  { %v899_v54 = vrot.slane %v830_v34, %v2893_v21  ;;  %v926_v2 = vsel %vm925_vm5, %v891_v8, %v924_v24 }
 0x3ea   :  { %v900_v34 = vsel %vm854_vm1, %v899_v54, %v895_v33 }
 0x3eb   :  { %v836_v31 = vpop.permute.xlu1 %835  ;;  %v928_v5 = vsel %vm927_vm6, %v900_v34, %v926_v2 }
 0x3ec   :  { %v908_v16 = vrot.slane %v836_v31, %v2893_v21 }
 0x3ee   :  { %v909_v50 = vsel %vm854_vm1, %v908_v16, %v904_v44 }
 0x3ef   :  { %v842_v13 = vpop.permute.xlu1 %841  ;;  %v930_v58 = vsel %vm929_vm7, %v909_v50, %v928_v5 }
 0x3f0   :  { %v917_v29 = vrot.slane %v842_v13, %v2893_v21 }
 0x3f2   :  { %v918_v37 = vsel %vm854_vm1, %v917_v29, %v913_v20 }
 0x3f3   :  { %v932_v60 = vsel %vm931_vm8, %v918_v37, %v930_v58 }
 0x3f4   :  { %v935_v7 = vsel %vm934_vm9, %v932_v60, -inf }
 0x3f5   :  { %936 = vmax.xlane.f32.xlu0 %v935_v7 }
 0x482   :  { %v937_v53 = vpop.xlane.xlu0 %936 }
 0x483   :  { %v942_v54 = vrot.slane %v937_v53, %v2734_v30  ;;  %v946_v59 = vrot.slane %v937_v53, %v2740_v32  ;;  %v958_v31 = vrot.slane %v937_v53, %v2841_v0  ;;  %v2938_v24 = vrot.slane %v937_v53, %v2863_v19 }
 0x484   :  { %v950_v8 = vrot.slane %v937_v53, %v2749_v43  ;;  %v954_v29 = vrot.slane %v937_v53, %v2745_v35 }
 0x485   :  { %v979_v9 = vsub.f32 %v2826_v49, %v942_v54  ;;  %v980_v33 = vsub.f32 %v2824_v48, %v942_v54  ;;  %v981_v40 = vsub.f32 %v2831_v52, %v946_v59  ;;  %v987_v44 = vsub.f32 %v2855_v14, %v958_v31 }
 0x486   :  { %v982_v49 = vsub.f32 %v2834_v57, %v946_v59  ;;  %v993_v48 = vsub.f32 %v2875_v39, %v2938_v24  ;;  %v983_v52 = vsub.f32 %v2838_v63, %v950_v8  ;;  %v984_v2 = vsub.f32 %v2847_v3, %v950_v8 }
 0x487   :  { %v995_v16 = vmul.f32 1.442695, %v979_v9  ;;  %v997_v28 = vmul.f32 1.442695, %v980_v33  ;;  %v999_v34 = vmul.f32 1.442695, %v981_v40  ;;  %v985_v63 = vsub.f32 %v2873_v38, %v954_v29 }
 0x488   :  { %v1011_v50 = vmul.f32 1.442695, %v987_v44  ;;  %v1001_v13 = vmul.f32 1.442695, %v982_v49  ;;  %v1023_v20 = vmul.f32 1.442695, %v993_v48  ;;  %v986_v3 = vsub.f32 %v2879_v42, %v954_v29 }
 0x489   :  { %2184 = vpow2.f32 %v995_v16  ;;  %v1003_v57 = vmul.f32 1.442695, %v983_v52  ;;  %v1005_v39 = vmul.f32 1.442695, %v984_v2  ;;  %v1007_v60 = vmul.f32 1.442695, %v985_v63 }
 0x48a   :  { %2186 = vpow2.f32 %v997_v28  ;;  %v962_v38 = vrot.slane %v937_v53, %v2845_v1  ;;  %v988_v9 = vsub.f32 %v2865_v22, %v958_v31  ;;  %v1009_v59 = vmul.f32 1.442695, %v986_v3 }
 0x48b   :  { %2188 = vpow2.f32 %v999_v34  ;;  %v966_v44 = vrot.slane %v937_v53, %v2853_v10 }
 0x48c   :  { %2190 = vpow2.f32 %v1011_v50  ;;  %v989_v42 = vsub.f32 %v2857_v15, %v962_v38  ;;  %v1013_v16 = vmul.f32 1.442695, %v988_v9  ;;  %v990_v22 = vsub.f32 %v2882_v45, %v962_v38 }
 0x48d   :  { %2192 = vpow2.f32 %v1001_v13  ;;  %v991_v34 = vsub.f32 %v2867_v23, %v966_v44  ;;  %v992_v49 = vsub.f32 %v2885_v41, %v966_v44  ;;  %v994_v45 = vsub.f32 %v2888_v51, %v2938_v24 }
 0x48e   :  { %2194 = vpow2.f32 %v1023_v20  ;;  %v1015_v31 = vmul.f32 1.442695, %v989_v42  ;;  %v1017_v15 = vmul.f32 1.442695, %v990_v22 }
 0x48f   :  { %2196 = vpow2.f32 %v1003_v57  ;;  %v1019_v53 = vmul.f32 1.442695, %v991_v34  ;;  %v1021_v48 = vmul.f32 1.442695, %v992_v49  ;;  %v1025_v52 = vmul.f32 1.442695, %v994_v45 }
 0x490   :  { %2198 = vpow2.f32 %v1005_v39 }
 0x491   :  { %2200 = vpow2.f32 %v1007_v60 }
 0x492   :  { %2202 = vpow2.f32 %v1009_v59 }
 0x493   :  { %v2945_v14 = vpop.eup %2184  ;;  %2204 = vpow2.f32 %v1013_v16 }
 0x494   :  { %1044 = vperm.xlu1 %2166, %v2945_v14   ;;  %v2950_v5 = vpop.eup %2186  ;;  %2206 = vpow2.f32 %v1015_v31 }
 0x495   :  { %v2954_v37 = vpop.eup %2188  ;;  %2208 = vpow2.f32 %v1017_v15 }
 0x496   :  { %v2956_v58 = vpop.eup %2190  ;;  %2210 = vpow2.f32 %v1019_v53 }
 0x497   :  { %1068 = vperm.xlu0 %2167, %v2956_v58   ;;  %v2961_v7 = vpop.eup %2192  ;;  %2212 = vpow2.f32 %v1021_v48 }
 0x498   :  { %1047 = vperm.xlu1 %2166, %v2950_v5   ;;  %v2964_v54 = vpop.eup %2194  ;;  %2214 = vpow2.f32 %v1025_v52 }
 0x499   :  { %v2969_v33 = vpop.eup %2196 }
 0x49a   :  { %v2973_v40 = vpop.eup %2198 }
 0x49b   :  { %1086 = vperm.xlu0 %2167, %v2964_v54   ;;  %v2978_v28 = vpop.eup %2200 }
 0x49c   :  { %1050 = vperm.xlu1 %2166, %v2954_v37   ;;  %v2982_v8 = vpop.eup %2202 }
 0x49d   :  { %v2986_v50 = vpop.eup %2204 }
 0x49e   :  { %v2991_v23 = vpop.eup %2206 }
 0x49f   :  { %v2994_v13 = vpop.eup %2208 }
 0x4a0   :  { %1053 = vperm.xlu1 %2166, %v2961_v7   ;;  %v2997_v41 = vpop.eup %2210 }
 0x4a1   :  { %v3000_v20 = vpop.eup %2212 }
 0x4a2   :  { %v3003_v51 = vpop.eup %2214 }
 0x4a4   :  { %1056 = vperm.xlu1 %2166, %v2969_v33  }
 0x4a8   :  { %1059 = vperm.xlu1 %2166, %v2973_v40  }
 0x4ac   :  { %1062 = vperm.xlu1 %2166, %v2978_v28  }
 0x4b0   :  { %1065 = vperm.xlu1 %2166, %v2982_v8  }
 0x4b4   :  { %1071 = vperm.xlu1 %2166, %v2986_v50  }
 0x4b8   :  { %1074 = vperm.xlu1 %2166, %v2991_v23  }
 0x4bc   :  { %1077 = vperm.xlu1 %2166, %v2994_v13  }
 0x4c0   :  { %1080 = vperm.xlu1 %2166, %v2997_v41  }
 0x4c4   :  { %1083 = vperm.xlu1 %2166, %v3000_v20  }
 0x4c8   :  { %1089 = vperm.xlu1 %2166, %v3003_v51  }
 0x513   :  { %v1045_v24 = vpop.permute.xlu1 %1044 }
 0x514   :  { %v1094_v45 = vrot.slane %v1045_v24, %v2896_v27 }
 0x516   :  { %v1069_v16 = vpop.permute.xlu0 %1068 }
 0x517   :  { %v1048_v29 = vpop.permute.xlu1 %1047 }
 0x518   :  { %v1098_v31 = vrot.slane %v1048_v29, %v2893_v21 }
 0x51a   :  { %v1087_v24 = vpop.permute.xlu0 %1086 }
 0x51b   :  { %v1051_v2 = vpop.permute.xlu1 %1050 }
 0x51c   :  { %v1103_v34 = vrot.slane %v1051_v2, %v2896_v27  ;;  %v1099_v2 = vsel %vm854_vm1, %v1098_v31, %v1094_v45 }
 0x51f   :  { %v1054_v57 = vpop.permute.xlu1 %1053 }
 0x520   :  { %v1107_v42 = vrot.slane %v1054_v57, %v2893_v21 }
 0x522   :  { %v1108_v48 = vsel %vm854_vm1, %v1107_v42, %v1103_v34 }
 0x523   :  { %v1057_v63 = vpop.permute.xlu1 %1056  ;;  %v1163_v42 = vsel %vm919_vm2, %v1108_v48, %v1099_v2 }
 0x524   :  { %v1112_v49 = vrot.slane %v1057_v63, %v2896_v27 }
 0x527   :  { %v1060_v39 = vpop.permute.xlu1 %1059 }
 0x528   :  { %v1116_v44 = vrot.slane %v1060_v39, %v2893_v21  ;;  %v1130_v39 = vrot.slane %v1069_v16, %v2896_v27 }
 0x52a   :  { %v1117_v29 = vsel %vm854_vm1, %v1116_v44, %v1112_v49 }
 0x52b   :  { %v1063_v3 = vpop.permute.xlu1 %1062  ;;  %v1164_v16 = vsel %vm921_vm3, %v1117_v29, %v1163_v42 }
 0x52c   :  { %v1121_v52 = vrot.slane %v1063_v3, %v2896_v27 }
 0x52f   :  { %v1066_v60 = vpop.permute.xlu1 %1065 }
 0x530   :  { %v1125_v15 = vrot.slane %v1066_v60, %v2893_v21 }
 0x532   :  { %v1126_v60 = vsel %vm854_vm1, %v1125_v15, %v1121_v52 }
 0x533   :  { %v1072_v38 = vpop.permute.xlu1 %1071  ;;  %v1165_v34 = vsel %vm923_vm4, %v1126_v60, %v1164_v16 }
 0x534   :  { %v1134_v53 = vrot.slane %v1072_v38, %v2893_v21 }
 0x536   :  { %v1135_v3 = vsel %vm854_vm1, %v1134_v53, %v1130_v39 }
 0x537   :  { %v1075_v9 = vpop.permute.xlu1 %1074 }
 0x538   :  { %v1139_v63 = vrot.slane %v1075_v9, %v2896_v27  ;;  %v1157_v9 = vrot.slane %v1087_v24, %v2896_v27 }
 0x53b   :  { %v1078_v59 = vpop.permute.xlu1 %1077 }
 0x53c   :  { %v1143_v57 = vrot.slane %v1078_v59, %v2893_v21 }
 0x53e   :  { %v1144_v44 = vsel %vm854_vm1, %v1143_v57, %v1139_v63 }
 0x53f   :  { %v1081_v22 = vpop.permute.xlu1 %1080 }
 0x540   :  { %v1148_v59 = vrot.slane %v1081_v22, %v2896_v27 }
 0x543   :  { %v1084_v36 = vpop.permute.xlu1 %1083 }
 0x544   :  { %v1152_v38 = vrot.slane %v1084_v36, %v2893_v21  ;;  %v1166_v36 = vsel %vm925_vm5, %v1135_v3, %v1165_v34 }
 0x545   :  { %v1167_v45 = vsel %vm927_vm6, %v1144_v44, %v1166_v36  ;;  %v3161_v36 = vmov 0.0|0.0  }
 0x546   :  { %v1153_v31 = vsel %vm854_vm1, %v1152_v38, %v1148_v59 }
 0x547   :  { %v1090_v15 = vpop.permute.xlu1 %1089  ;;  %v1168_v22 = vsel %vm929_vm7, %v1153_v31, %v1167_v45  ;;  %v1411_v45 = vld [vmem:[#allocation13 + $0x20] sm:$0xff] }
 0x548   :  { %v1161_v49 = vrot.slane %v1090_v15, %v2893_v21  ;;  %v1407_v15 = vld [vmem:[#allocation13] sm:$0xff] }
 0x54a   :  { %v1162_v53 = vsel %vm854_vm1, %v1161_v49, %v1157_v9  ;;  %v1410_v49 = vld [vmem:[#allocation13 + $0x18] sm:$0xff] }
 0x54b   :  { %v1169_v48 = vsel %vm931_vm8, %v1162_v53, %v1168_v22  ;;  %v1412_v53 = vld [vmem:[#allocation13 + $0x28] sm:$0xff]  ;;  %v1414_v22 = vld [vmem:[#allocation13 + $0x38] sm:$0xff] }
 0x54c   :  { %v1171_v52 = vsel %vm934_vm9, %v1169_v48, 0.0 }
 0x54d   :  { %1172 = vadd.xlane.f32.xlu0 %v1171_v52  ;;  %v1416_v52 = vld [vmem:[#allocation13 + $0x48] sm:$0xff] }
 0x5da   :  { %v1173_v57 = vpop.xlane.xlu0 %1172 }
 0x5db   :  { %v1194_v39 = vrot.slane %v1173_v57, %v2841_v0  ;;  %v1178_v27 = vrot.slane %v1173_v57, %v2734_v30  ;;  %v1206_v29 = vrot.slane %v1173_v57, %v2863_v19  ;;  %v1182_v21 = vrot.slane %v1173_v57, %v2740_v32 }
 0x5dc   :  { %v1186_v38 = vrot.slane %v1173_v57, %v2749_v43  ;;  %v1190_v59 = vrot.slane %v1173_v57, %v2745_v35 }
 0x5dd   :  { %2216 = vrcp.f32 %v1194_v39  ;;  %v1417_v39 = vld [vmem:[#allocation13 + $0x50] sm:$0xff] }
 0x5de   :  { %2218 = vrcp.f32 %v1178_v27  ;;  %v1418_v27 = vld [vmem:[#allocation13 + $0x58] sm:$0xff] }
 0x5df   :  { %2220 = vrcp.f32 %v1206_v29  ;;  %v2080_v29 = vpack.c.bf16 %v1418_v27, %v1417_v39 }
 0x5e0   :  { %2222 = vrcp.f32 %v1182_v21  ;;  %v1419_v21 = vld [vmem:[#allocation13 + $0x60] sm:$0xff] }
 0x5e1   :  { %2224 = vrcp.f32 %v1186_v38  ;;  %v1422_v38 = vld [vmem:[#allocation13 + $0x78] sm:$0xff] }
 0x5e2   :  { %2226 = vrcp.f32 %v1190_v59 }
 0x5e7   :  { %v2217_v2 = vpop.eup %2216 }
 0x5e8   :  { %v2219_v60 = vpop.eup %2218  ;;  %v1228_v63 = vmul.f32 %v2217_v2, %v2956_v58 }
 0x5e9   :  { %v2221_v24 = vpop.eup %2220  ;;  %v1216_v42 = vmul.f32 %v2219_v60, %v2945_v14  ;;  %v1217_v19 = vmul.f32 %v2219_v60, %v2950_v5 }
 0x5ea   :  { %1281 = vperm.xlu0 %2167, %v1228_v63   ;;  %v1238_v0 = vmul.f32 %v2221_v24, %v3003_v51  ;;  %v2223_v3 = vpop.eup %2222  ;;  %v1198_v51 = vrot.slane %v1173_v57, %v2845_v1  ;;  %v1421_v63 = vld [vmem:[#allocation13 + $0x70] sm:$0xff] }
 0x5eb   :  { %1241 = vperm.xlu1 %2166, %v1216_v42   ;;  %v1219_v16 = vmul.f32 %v2223_v3, %v2954_v37  ;;  %v1220_v43 = vmul.f32 %v2223_v3, %v2961_v7  ;;  %v2225_v58 = vpop.eup %2224  ;;  %v1202_v37 = vrot.slane %v1173_v57, %v2853_v10  ;;  %v1229_v7 = vmul.f32 %v2217_v2, %v2986_v50  ;;  %v1420_v2 = vld [vmem:[#allocation13 + $0x68] sm:$0xff]  ;;  %v1591_v42 = vld [vmem:[#allocation14 + $0x18] sm:$0xff] }
 0x5ec   :  { %v1222_v14 = vmul.f32 %v2225_v58, %v2969_v33  ;;  %v1223_v5 = vmul.f32 %v2225_v58, %v2973_v40  ;;  %v2227_v44 = vpop.eup %2226  ;;  %2228 = vrcp.f32 %v1198_v51  ;;  %v1237_v50 = vmul.f32 %v2221_v24, %v2964_v54  ;;  %v1415_v54 = vld [vmem:[#allocation13 + $0x40] sm:$0xff]  ;;  %v1589_v24 = vld [vmem:[#allocation14 + $0x8] sm:$0xff] }
 0x5ed   :  { %v1225_v35 = vmul.f32 %v2227_v44, %v2978_v28  ;;  %v1226_v34 = vmul.f32 %v2227_v44, %v2982_v8  ;;  %2230 = vrcp.f32 %v1202_v37  ;;  %v1408_v8 = vld [vmem:[#allocation13 + $0x8] sm:$0xff]  ;;  %v2077_v57 = vpack.c.bf16 %v1416_v52, %v1415_v54 }
 0x5ee   :  { %1316 = vperm.xlu0 %2167, %v1238_v0   ;;  %v2065_v9 = vpack.c.bf16 %v1408_v8, %v1407_v15  ;;  %v2083_v60 = vpack.c.bf16 %v1420_v2, %v1419_v21  ;;  %v2086_v0 = vpack.c.bf16 %v1422_v38, %v1421_v63  ;;  %v3162_v38 = vld [vmem:[#allocation28_spill] sm:$0xff] }
 0x5ef   :  { %1246 = vperm.xlu1 %2166, %v1217_v19   ;;  %v2112_v19 = vpack.c.bf16 %v1591_v42, %v1589_v24 }
 0x5f0   :  { %2066 = vmatpush3.bf16.msra.mxu1 %v2065_v9 }
 0x5f1   :  { %2067 = vmatprep.subr.bf16.mxu1 %v3161_v36 }
 0x5f3   :  { %1251 = vperm.xlu1 %2166, %v1219_v16  }
 0x5f6   :  { %v2229_v33 = vpop.eup %2228 }
 0x5f7   :  { %1256 = vperm.xlu1 %2166, %v1220_v43   ;;  %v1231_v1 = vmul.f32 %v2229_v33, %v2991_v23  ;;  %v1232_v40 = vmul.f32 %v2229_v33, %v2994_v13  ;;  %v2231_v31 = vpop.eup %2230  ;;  %v1409_v23 = vld [vmem:[#allocation13 + $0x10] sm:$0xff] }
 0x5f8   :  { %v1234_v28 = vmul.f32 %v2231_v31, %v2997_v41  ;;  %v1235_v10 = vmul.f32 %v2231_v31, %v3000_v20  ;;  %v2068_v13 = vpack.c.bf16 %v1410_v49, %v1409_v23  ;;  %v2071_v41 = vpack.c.bf16 %v1412_v53, %v1411_v45  ;;  %v1413_v20 = vld [vmem:[#allocation13 + $0x30] sm:$0xff] }
 0x5f9   :  { %v2074_v48 = vpack.c.bf16 %v1414_v22, %v1413_v20 }
 0x5fa   :  { %2069 = vmatpush3.bf16.msra.mxu1 %v2068_v13 }
 0x5fb   :  { %1261 = vperm.xlu1 %2166, %v1222_v14   ;;  %2070 = vmatprep.subr.bf16.mxu1 %v3161_v36 }
 0x5fe   :  { %2072 = vmatpush3.bf16.msra.mxu1 %v2071_v41 }
 0x5ff   :  { %1266 = vperm.xlu1 %2166, %v1223_v5   ;;  %2073 = vmatprep.subr.bf16.mxu1 %v3161_v36 }
 0x602   :  { %2075 = vmatpush3.bf16.msra.mxu1 %v2074_v48 }
 0x603   :  { %1271 = vperm.xlu1 %2166, %v1225_v35   ;;  %2076 = vmatprep.subr.bf16.mxu1 %v3161_v36 }
 0x606   :  { %2078 = vmatpush3.bf16.msra.mxu1 %v2077_v57 }
 0x607   :  { %1276 = vperm.xlu1 %2166, %v1226_v34   ;;  %2079 = vmatprep.subr.bf16.mxu1 %v3161_v36 }
 0x60a   :  { %2081 = vmatpush3.bf16.msra.mxu1 %v2080_v29 }
 0x60b   :  { %1286 = vperm.xlu1 %2166, %v1229_v7   ;;  %2082 = vmatprep.subr.bf16.mxu1 %v3161_v36 }
 0x60e   :  { %2084 = vmatpush3.bf16.msra.mxu1 %v2083_v60 }
 0x60f   :  { %1291 = vperm.xlu1 %2166, %v1231_v1   ;;  %2085 = vmatprep.subr.bf16.mxu1 %v3161_v36 }
 0x612   :  { %2087 = vmatpush3.bf16.msra.mxu1 %v2086_v0 }
 0x613   :  { %1296 = vperm.xlu1 %2166, %v1232_v40   ;;  %2113 = vmatprep.subr.bf16.mxu1 %v2112_v19 }
 0x617   :  { %1301 = vperm.xlu1 %2166, %v1234_v28  }
 0x61b   :  { %1306 = vperm.xlu1 %2166, %v1235_v10  }
 0x61f   :  { %1311 = vperm.xlu1 %2166, %v1237_v50  }
 0x669   :  { %v1282_v34 = vpop.permute.xlu0 %1281 }
 0x66a   :  { %v1242_v3 = vpop.permute.xlu1 %1241 }
 0x66b   :  { %v1319_v28 = vmul.f32 %v1242_v3, %v2767_v47 }
 0x66d   :  { %v1317_v39 = vpop.permute.xlu0 %1316 }
 0x66e   :  { %v1247_v59 = vpop.permute.xlu1 %1246  ;;  %v1334_v24 = vmul.f32 %v1317_v39, %v3162_v38  ;;  %v3164_v39 = vmov 0.0   ;;  %v1602_v38 = vld [vmem:[#allocation14 + $0x70] sm:$0xff] }
 0x66f   :  { %v1320_v7 = vmul.f32 %v1247_v59, %v2765_v46 }
 0x671   :  { %v1335_v9 = vadd.f32 %v1320_v7, %v1319_v28 }
 0x672   :  { %v1252_v16 = vpop.permute.xlu1 %1251 }
 0x673   :  { %v1321_v33 = vmul.f32 %v1252_v16, %v2775_v56  ;;  %v3163_v16 = vld [vmem:[#allocation29_spill] sm:$0xff] }
 0x676   :  { %v1257_v43 = vpop.permute.xlu1 %1256 }
 0x677   :  { %v1322_v44 = vmul.f32 %v1257_v43, %v2773_v55  ;;  %v1327_v55 = vmul.f32 %v1282_v34, %v2789_v6 }
 0x679   :  { %v1342_v10 = vadd.f32 %v1322_v44, %v1321_v33 }
 0x67a   :  { %v1262_v58 = vpop.permute.xlu1 %1261 }
 0x67b   :  { %v1323_v40 = vmul.f32 %v1262_v58, %v2782_v62  ;;  %v1343_v36 = vrot.slane %v1342_v10, 4 }
 0x67d   :  { %v1344_v13 = vadd.f32 %v1343_v36, %v1342_v10 }
 0x67e   :  { %v1267_v14 = vpop.permute.xlu1 %1266 }
 0x67f   :  { %v1324_v35 = vmul.f32 %v1267_v14, %v2780_v61  ;;  %v1345_v48 = vrot.slane %v1344_v13, 2 }
 0x681   :  { %v1349_v61 = vadd.f32 %v1324_v35, %v1323_v40  ;;  %v1346_v2 = vadd.f32 %v1345_v48, %v1344_v13 }
 0x682   :  { %v1272_v51 = vpop.permute.xlu1 %1271 }
 0x683   :  { %v1325_v15 = vmul.f32 %v1272_v51, %v2796_v12  ;;  %v1350_v56 = vrot.slane %v1349_v61, 4  ;;  %v1347_v14 = vrot.slane %v1346_v2, 1 }
 0x685   :  { %v1351_v12 = vadd.f32 %v1350_v56, %v1349_v61  ;;  %v1348_v33 = vadd.f32 %v1347_v14, %v1346_v2 }
 0x686   :  { %v1277_v5 = vpop.permute.xlu1 %1276 }
 0x687   :  { %v1326_v1 = vmul.f32 %v1277_v5, %v2794_v11  ;;  %v1336_v11 = vrot.slane %v1335_v9, 4  ;;  %v1352_v52 = vrot.slane %v1351_v12, 2 }
 0x689   :  { %v1356_v50 = vadd.f32 %v1326_v1, %v1325_v15  ;;  %v1337_v6 = vadd.f32 %v1336_v11, %v1335_v9  ;;  %v1353_v42 = vadd.f32 %v1352_v52, %v1351_v12  ;;  %v1590_v11 = vld [vmem:[#allocation14 + $0x10] sm:$0xff]  ;;  %v1599_v52 = vld [vmem:[#allocation14 + $0x58] sm:$0xff] }
 0x68a   :  { %v1287_v37 = vpop.permute.xlu1 %1286 }
 0x68b   :  { %v1328_v31 = vmul.f32 %v1287_v37, %v2787_v4  ;;  %v1357_v49 = vrot.slane %v1356_v50, 4  ;;  %v1338_v27 = vrot.slane %v1337_v6, 2  ;;  %v1354_v44 = vrot.slane %v1353_v42, 1 }
 0x68d   :  { %v1363_v46 = vadd.f32 %v1328_v31, %v1327_v55  ;;  %v1358_v41 = vadd.f32 %v1357_v49, %v1356_v50  ;;  %v1339_v19 = vadd.f32 %v1338_v27, %v1337_v6  ;;  %v1355_v28 = vadd.f32 %v1354_v44, %v1353_v42  ;;  %v1605_v42 = vld [vmem:[#allocation14 + $0x88] sm:$0xff]  ;;  %v1615_v44 = vld [vmem:[#allocation14 + $0xd8] sm:$0xff] }
 0x68e   :  { %v1292_v8 = vpop.permute.xlu1 %1291 }
 0x68f   :  { %v1329_v62 = vmul.f32 %v1292_v8, %v2803_v18  ;;  %v1364_v47 = vrot.slane %v1363_v46, 4  ;;  %v1359_v29 = vrot.slane %v1358_v41, 2 }
 0x691   :  { %v1365_v22 = vadd.f32 %v1364_v47, %v1363_v46  ;;  %v1360_v3 = vadd.f32 %v1359_v29, %v1358_v41  ;;  %v1595_v47 = vld [vmem:[#allocation14 + $0x38] sm:$0xff]  ;;  %v1596_v29 = vld [vmem:[#allocation14 + $0x40] sm:$0xff] }
 0x692   :  { %v1297_v23 = vpop.permute.xlu1 %1296 }
 0x693   :  { %v1330_v4 = vmul.f32 %v1297_v23, %v2801_v17  ;;  %v1366_v21 = vrot.slane %v1365_v22, 2  ;;  %v1361_v35 = vrot.slane %v1360_v3, 1  ;;  %v1588_v23 = vld [vmem:[#allocation14] sm:$0xff] }
 0x695   :  { %v1370_v45 = vadd.f32 %v1330_v4, %v1329_v62  ;;  %v1367_v58 = vadd.f32 %v1366_v21, %v1365_v22  ;;  %v1362_v15 = vadd.f32 %v1361_v35, %v1360_v3  ;;  %v1593_v4 = vld [vmem:[#allocation14 + $0x28] sm:$0xff]  ;;  %v1594_v22 = vld [vmem:[#allocation14 + $0x30] sm:$0xff]  ;;  %v1603_v21 = vld [vmem:[#allocation14 + $0x78] sm:$0xff] }
 0x696   :  { %v1302_v53 = vpop.permute.xlu1 %1301  ;;  %v2116_v41 = vpack.c.bf16 %v1595_v47, %v1593_v4 }
 0x697   :  { %v1371_v20 = vrot.slane %v1370_v45, 4  ;;  %v1331_v18 = vmul.f32 %v1302_v53, %v2810_v26  ;;  %v1368_v7 = vrot.slane %v1367_v58, 1  ;;  %v2114_v53 = vpack.c.bf16 %v1590_v11, %v1588_v23 }
 0x699   :  { %v1372_v54 = vadd.f32 %v1371_v20, %v1370_v45  ;;  %v1369_v8 = vadd.f32 %v1368_v7, %v1367_v58  ;;  %v1592_v20 = vld [vmem:[#allocation14 + $0x20] sm:$0xff]  ;;  %v1617_v7 = vld [vmem:[#allocation14 + $0xe8] sm:$0xff] }
 0x69a   :  { %v1307_v57 = vpop.permute.xlu1 %1306 }
 0x69b   :  { %v1332_v17 = vmul.f32 %v1307_v57, %v2808_v25  ;;  %v1373_v60 = vrot.slane %v1372_v54, 2  ;;  %v1340_v25 = vrot.slane %v1339_v19, 1  ;;  %v2118_v57 = vpack.c.bf16 %v1594_v22, %v1592_v20 }
 0x69d   :  { %v1377_v63 = vadd.f32 %v1332_v17, %v1331_v18  ;;  %v1374_v51 = vadd.f32 %v1373_v60, %v1372_v54  ;;  %v1341_v10 = vadd.f32 %v1340_v25, %v1339_v19  ;;  %v1597_v54 = vld [vmem:[#allocation14 + $0x48] sm:$0xff]  ;;  %v1598_v18 = vld [vmem:[#allocation14 + $0x50] sm:$0xff]  ;;  %v1604_v19 = vld [vmem:[#allocation14 + $0x80] sm:$0xff] }
 0x69e   :  { %v1312_v0 = vpop.permute.xlu1 %1311  ;;  %v2120_v27 = vpack.c.bf16 %v1599_v52, %v1597_v54  ;;  %v1601_v17 = vld [vmem:[#allocation14 + $0x68] sm:$0xff]  ;;  %v2122_v2 = vpack.c.bf16 %v1598_v18, %v1596_v29 }
 0x69f   :  { %v1378_v59 = vrot.slane %v1377_v63, 4  ;;  %v1333_v43 = vmul.f32 %v1312_v0, %v3163_v16  ;;  %v1375_v1 = vrot.slane %v1374_v51, 1  ;;  %v1431_v9 = vsel %vm919_vm2, %v1348_v33, %v1341_v10  ;;  %v1607_v0 = vld [vmem:[#allocation14 + $0x98] sm:$0xff]  ;;  %v1609_v16 = vld [vmem:[#allocation14 + $0xa8] sm:$0xff] }
 0x6a0   :  { %v1432_v36 = vsel %vm921_vm3, %v1355_v28, %v1431_v9  ;;  %v2124_v60 = vpack.c.bf16 %v1603_v21, %v1601_v17  ;;  %v2128_v3 = vpack.c.bf16 %v1607_v0, %v1605_v42  ;;  %v1619_v33 = vld [vmem:[#allocation14 + $0xf8] sm:$0xff]  ;;  %v1618_v28 = vld [vmem:[#allocation14 + $0xf0] sm:$0xff] }
 0x6a1   :  { %v1379_v5 = vadd.f32 %v1378_v59, %v1377_v63  ;;  %v1384_v26 = vadd.f32 %v1334_v24, %v1333_v43  ;;  %v1376_v50 = vadd.f32 %v1375_v1, %v1374_v51  ;;  %v1433_v62 = vsel %vm923_vm4, %v1362_v15, %v1432_v36  ;;  %v1600_v63 = vld [vmem:[#allocation14 + $0x60] sm:$0xff]  ;;  %v1606_v59 = vld [vmem:[#allocation14 + $0x90] sm:$0xff]  ;;  %v1611_v43 = vld [vmem:[#allocation14 + $0xb8] sm:$0xff] }
 0x6a2   :  { %v1434_v13 = vsel %vm925_vm5, %v1369_v8, %v1433_v62  ;;  %v2126_v24 = vpack.c.bf16 %v1602_v38, %v1600_v63  ;;  %v2130_v58 = vpack.c.bf16 %v1606_v59, %v1604_v19  ;;  %v2132_v14 = vpack.c.bf16 %v1611_v43, %v1609_v16  ;;  %v1608_v51 = vld [vmem:[#allocation14 + $0xa0] sm:$0xff] }
 0x6a3   :  { %v1380_v37 = vrot.slane %v1379_v5, 2  ;;  %v1385_v34 = vrot.slane %v1384_v26, 4  ;;  %v1435_v12 = vsel %vm927_vm6, %v1376_v50, %v1434_v13 }
 0x6a5   :  { %v1381_v40 = vadd.f32 %v1380_v37, %v1379_v5  ;;  %v1386_v31 = vadd.f32 %v1385_v34, %v1384_v26  ;;  %v1610_v5 = vld [vmem:[#allocation14 + $0xb0] sm:$0xff]  ;;  %v1613_v26 = vld [vmem:[#allocation14 + $0xc8] sm:$0xff]  ;;  %v1612_v37 = vld [vmem:[#allocation14 + $0xc0] sm:$0xff] }
 0x6a6   :  { %v2134_v25 = vpack.c.bf16 %v1610_v5, %v1608_v51  ;;  %v2136_v35 = vpack.c.bf16 %v1615_v44, %v1613_v26  ;;  %v1614_v34 = vld [vmem:[#allocation14 + $0xd0] sm:$0xff] }
 0x6a7   :  { %v1382_v55 = vrot.slane %v1381_v40, 1  ;;  %v1387_v61 = vrot.slane %v1386_v31, 2  ;;  %v2138_v1 = vpack.c.bf16 %v1614_v34, %v1612_v37 }
 0x6a9   :  { %v1388_v46 = vadd.f32 %v1387_v61, %v1386_v31  ;;  %v1383_v56 = vadd.f32 %v1382_v55, %v1381_v40  ;;  %v2140_v40 = vpack.c.bf16 %v1619_v33, %v1617_v7  ;;  %v1616_v31 = vld [vmem:[#allocation14 + $0xe0] sm:$0xff]  ;;  %v1755_v55 = vld [vmem:[%s3147_s9] ss:$0 sm:$0xff] }
 0x6aa   :  { %v2142_v10 = vpack.c.bf16 %v1618_v28, %v1616_v31  ;;  %v3165_v61 = vld [vmem:[#allocation27_spill] sm:$0xff] }
 0x6ab   :  { %v1389_v49 = vrot.slane %v1388_v46, 1  ;;  %v1436_v6 = vsel %vm929_vm7, %v1383_v56, %v1435_v12 }
 0x6ad   :  { %v1390_v45 = vadd.f32 %v1389_v49, %v1388_v46 }
 0x6af   :  { %v1437_v48 = vsel %vm931_vm8, %v1390_v45, %v1436_v6 }
 0x6b0   :  { %1875 = vmatmul.mubr.f32.vlgmr.msra.gmra.mrb[2].mxu1 %v1437_v48 }
 0x6b1   :  { %2115 = vmatpush1.bf16.msra.mxu1 %v2114_v53  ;;  %1696 = vmatprep.mubr.f32.mxu1 %v3164_v39 }
 0x6b2   :  { %2117 = vmatprep.subr.bf16.mxu1 %v2116_v41 }
 0x6b5   :  { %2119 = vmatpush1.bf16.msra.mxu1 %v2118_v57 }
 0x6b6   :  { %2121 = vmatprep.subr.bf16.mxu1 %v2120_v27 }
 0x6b9   :  { %2123 = vmatpush1.bf16.msra.mxu1 %v2122_v2 }
 0x6ba   :  { %2125 = vmatprep.subr.bf16.mxu1 %v2124_v60 }
 0x6bd   :  { %2127 = vmatpush1.bf16.msra.mxu1 %v2126_v24 }
 0x6be   :  { %2129 = vmatprep.subr.bf16.mxu1 %v2128_v3 }
 0x6c1   :  { %2131 = vmatpush1.bf16.msra.mxu1 %v2130_v58 }
 0x6c2   :  { %2133 = vmatprep.subr.bf16.mxu1 %v2132_v14 }
 0x6c5   :  { %2135 = vmatpush1.bf16.msra.mxu1 %v2134_v25 }
 0x6c6   :  { %2137 = vmatprep.subr.bf16.mxu1 %v2136_v35 }
 0x6c9   :  { %2139 = vmatpush1.bf16.msra.mxu1 %v2138_v1 }
 0x6ca   :  { %2141 = vmatprep.subr.bf16.mxu1 %v2140_v40 }
 0x6cd   :  { %2143 = vmatpush1.bf16.msra.mxu1 %v2142_v10 }
 0x783   :  { %v1505_v15 = vpop.f32.mrb[2].mxu1 }
 0x784   :  { %v1576_v8 = vadd.f32 %v3165_v61, %v1505_v15  ;;  %v1876_v9 = vpop.f32.mrb[3].mxu1 }
 0x786   :  { %v1586_v50 = vadd.f32 %v1755_v55, %v1576_v8 }
 0x788   :  { %2232 = vtanh.f32 %v1586_v50 }
 0x792   :  { %v2233_v46 = vpop.eup %2232 }
 0x793   :  { %1697 = vmatmul.mubr.f32.vlgmr.msra.gmra.mrb[4].mxu1 %v2233_v46 }
 0x794   :  { %2421 = shalt.err (!%p2418_p12)
}
 0x795   :  { %s2422_s9 = scalar_lea.hbm %s3151_s13, 128 }
 0x796   :  { %p2423_p13 = scmp.ne.s32.totalorder %s3151_s13, %s2422_s9  ;;  %p2426_p0 = scmp.lt.u32.totalorder %s2422_s9, %s3151_s13 }
 0x798   :  { %p2428_p1 = pnand %p2426_p0, %p2423_p13 }
 0x79a   :  { %2431 = shalt.err (!%p2428_p1)
}
 0x79b   :  { %1724 = dma.vmem_to_hbm [thread:$0]  %s1722_s28, 128, %s3151_s13, [#allocation18]  }
 0x79c   :  { %s2510_s30 = smov [#allocation19]  }
 0x79d   :  { %s1731_s2 = sshll.u32 %s2510_s30, 4  ;;  %s1732_s2 = int_to_ptr.vmem [resolvable:$true] %s1731_s2 }
 0x79e   :  { %s2432_s18 = scalar_lea.vmem %s1732_s2, 128  ;;  %p2437_p3 = scmp.lt.s32.totalorder %s1732_s2, %s1732_s2 }
 0x79f   :  { %p2433_p2 = scmp.ne.s32.totalorder %s1732_s2, %s2432_s18  ;;  %p2438_p4 = scmp.lt.s32.totalorder %s2432_s18, %s2432_s18 }
 0x7a1   :  { %p2439_p5 = por %p2438_p4, %p2437_p3 }
 0x7a3   :  { %p2440_p6 = pnand %p2439_p5, %p2433_p2 }
 0x7a5   :  { %2443 = shalt.err (!%p2440_p6)
}
 0x7a6   :  { %s2444_s8 = scalar_lea.hbm %s3152_s14, 128 }
 0x7a7   :  { %p2445_p7 = scmp.ne.s32.totalorder %s3152_s14, %s2444_s8  ;;  %p2448_p8 = scmp.lt.u32.totalorder %s2444_s8, %s3152_s14 }
 0x7a9   :  { %p2450_p9 = pnand %p2448_p8, %p2445_p7 }
 0x7ab   :  { %2453 = shalt.err (!%p2450_p9)
}
 0x7ac   :  { %1734 = dma.vmem_to_hbm [thread:$0]  %s1732_s2, 128, %s3152_s14, [#allocation18]   ;;  %v1620_v36 = vld [vmem:[%s3149_s11] sm:$0x3] }
 0x7ad   :  { %v1625_v56 = vrot.slane %v1620_v36, %v2734_v30  ;;  %v1629_v23 = vrot.slane %v1620_v36, %v2740_v32  ;;  %s2511_s6 = smov [#allocation16]  }
 0x7ae   :  { %s1711_s0 = sshll.u32 %s2511_s6, 4  ;;  %s1712_s0 = int_to_ptr.vmem [resolvable:$true] %s1711_s0 }
 0x7af   :  { %s2454_s26 = scalar_lea.vmem %s1712_s0, 256  ;;  %p2459_p11 = scmp.lt.s32.totalorder %s1712_s0, %s1712_s0 }
 0x7b0   :  { %p2455_p10 = scmp.ne.s32.totalorder %s1712_s0, %s2454_s26  ;;  %p2460_p12 = scmp.lt.s32.totalorder %s2454_s26, %s2454_s26 }
 0x7b2   :  { %p2461_p13 = por %p2460_p12, %p2459_p11 }
 0x7b4   :  { %p2462_p0 = pnand %p2461_p13, %p2455_p10 }
 0x866   :  { %v1698_v11 = vpop.f32.mrb[4].mxu1 }
 0x867   :  { %v1699_v49 = vadd.f32 %v1698_v11, %v1625_v56  ;;  %v1700_v62 = vpop.f32.mrb[5].mxu1 }
 0x868   :  { %v1701_v4 = vadd.f32 %v1700_v62, %v1629_v23 }
 0x869   :  { %1703 = vst [vmem:[#allocation16] sm:$0xff] %v1699_v49 }
 0x86a   :  { %1704 = vst [vmem:[#allocation16 + $0x8] sm:$0xff] %v1701_v4 }
 0x86b   :  { %2465 = shalt.err (!%p2462_p0)
}
 0x86c   :  { %s2466_s28 = scalar_lea.hbm %s3150_s12, 256 }
 0x86d   :  { %p2467_p1 = scmp.ne.s32.totalorder %s3150_s12, %s2466_s28  ;;  %p2470_p2 = scmp.lt.u32.totalorder %s2466_s28, %s3150_s12 }
 0x86f   :  { %p2472_p3 = pnand %p2470_p2, %p2467_p1 }
 0x871   :  { %2475 = shalt.err (!%p2472_p3)
}
 0x872   :  { %1714 = dma.vmem_to_hbm [thread:$0]  %s1712_s0, 256, %s3150_s12, [#allocation4]  }
 0x873   :  { %2486 = dma.done.wait [#allocation4], 256  }
 0x874   :  { %2487 = vsyncadd [#allocation4], 4294967040 }
 0x875   :  { %2488 = dma.done.wait [#allocation18], 256  }
 0x876   :  { %2489 = vsyncadd [#allocation18], 4294967040 }
 0x877   :  { %1744 = vsyncpa [#allocation3], 1 }
 0x878   :  { %1745 = vsyncpa [#allocation6], 1 }
 0x879   :  { %1746 = vsyncpa [#allocation9], 1 }
 0x87a   :  { %1747 = vsyncpa [#allocation12], 1 }
 0x87b   :  { %1748 = vsyncpa [#allocation15], 1 }
 0x87c   :  { %1749 = vsyncpa [#allocation4], 1 }
 0x87d   :  { %1750 = vsyncpa [#allocation18], 1 }

</bundles_post_ra>
